<compile_context>
chip_gen: v5e
topology: v5e:2x2
jax: 0.10.0
libtpu: 0.0.40
codegen_flags: <defaults>
</compile_context>

<pallas_src>
import functools

import jax
import jax.numpy as jnp
from jax import lax
from jax.experimental import pallas as pl
from jax.experimental.pallas import tpu as pltpu

# Deterministic "parameters" from __init__(alpha=0.25, gamma=2)
ALPHA = 0.25
GAMMA = 2  # hard-coded in-kernel as an explicit square

_LANES = 128
_SUBLANES = 8
_N_SPLITS = 2          # leading "parallel" grid axis -> both TCs on v7x
_MAX_TILE_ROWS = 4096  # (4096,128) f32 block = 2 MiB; ~8 MiB live double-buffered
_CHUNK_ROWS = 512      # inner fori_loop chunk -> bounded live temporaries
_MIN_PALLAS_N = 64 * 1024  # below this, a fused XLA expression is faster


def _focal_terms(x, tf):
    """Per-element focal loss, f32 in / f32 out.  Binary targets assumed
    (matches the reference alpha_vec.gather for t in {0, 1})."""
    e = jnp.exp(-jnp.abs(x))
    bce = jnp.maximum(x, 0.0) - x * tf + jnp.log1p(e)   # stable BCE-with-logits
    pt = jnp.exp(-bce)
    omp = 1.0 - pt
    at = ALPHA + (1.0 - 2.0 * ALPHA) * tf                # [alpha, 1-alpha][t]
    return at * (omp * omp) * bce                         # gamma == 2


def _focal_sum_jnp(x, t):
    """Fused-XLA sum of focal terms (fast path / tail handling)."""
    if x.size == 0:
        return jnp.float32(0.0)
    return jnp.sum(
        _focal_terms(x.astype(jnp.float32), t.astype(jnp.float32)),
        dtype=jnp.float32)


def _focal_kernel(x_ref, t_ref, out_ref, *, rows, tile_rows, chunk_rows,
                  tiles_per_split):
    c = pl.program_id(0)   # "parallel" split (megacore on v7x)
    i = pl.program_id(1)   # "arbitrary" streaming axis

    @pl.when(i == 0)
    def _init():
        out_ref[...] = jnp.zeros(out_ref.shape, jnp.float32)

    # Virtual global start row of this tile (may exceed `rows` for the clamped
    # trailing tiles of the split -> fully masked below).
    row0 = (c * tiles_per_split + i) * tile_rows
    n_chunks = tile_rows // chunk_rows

    def accum(masked):
        def body(j, carry):
            r0 = pl.multiple_of(j * chunk_rows, chunk_rows)
            x = x_ref[pl.ds(r0, chunk_rows), :].astype(jnp.float32)
            tf = t_ref[pl.ds(r0, chunk_rows), :].astype(jnp.float32)
            f = _focal_terms(x, tf)
            if masked:
                ridx = row0 + r0 + lax.broadcasted_iota(
                    jnp.int32, (chunk_rows, _LANES), 0)
                # Select (not multiply): OOB garbage may be NaN/Inf.
                f = jnp.where(ridx < rows, f, 0.0)
            # Fold (chunk,128) -> resident (8,128) partials on the VPU only.
            out_ref[0] += jnp.sum(f.reshape(-1, _SUBLANES, _LANES), axis=0)
            return carry
        lax.fori_loop(0, n_chunks, body, 0)

    full = row0 + tile_rows <= rows

    @pl.when(full)
    def _full_tile():
        accum(masked=False)

    @pl.when(jnp.logical_not(full))
    def _partial_tile():
        accum(masked=True)


def weighted_focal_loss(inputs, targets, *, min_pallas_n=_MIN_PALLAS_N):
    """Mean focal loss matching ctgan.WeightedFocalLoss(alpha=0.25, gamma=2).

    inputs:  logits, any shape, float dtype (f32/bf16 — no wrapper up-cast).
    targets: binary {0,1} labels, any shape, any dtype (bool/int8/float).
    """
    x = inputs.reshape(-1)
    t = targets.reshape(-1)
    if t.dtype == jnp.bool_:
        t = t.astype(jnp.int8)
    n = x.shape[0]

    rows = n // _LANES
    if n < min_pallas_n or rows < 32:
        # Small batches (typical CTGAN discriminator): fused XLA is faster than
        # a pallas_call launch + reduce.
        return _focal_sum_jnp(x, t) / jnp.float32(n)

    n_body = rows * _LANES
    # Sub-128 remainder handled by a tiny fused XLA expression.
    tail_sum = _focal_sum_jnp(x[n_body:], t[n_body:])

    # Zero-copy bitcast reshape when n % 128 == 0; otherwise XLA materializes a
    # single prefix-slice copy of the body (still far cheaper than the old
    # full-array pad-to-tile-granularity).
    x2 = (x if n_body == n else x[:n_body]).reshape(rows, _LANES)
    t2 = (t if n_body == n else t[:n_body]).reshape(rows, _LANES)

    # Tile selection: biggest power-of-two tile such that each split still gets
    # >= 2 inner steps for DMA/compute overlap, capped at _MAX_TILE_ROWS.
    tile_rows = 32
    tr = _MAX_TILE_ROWS
    while tr >= 32:
        if rows >= _N_SPLITS * 2 * tr:
            tile_rows = tr
            break
        tr //= 2
    chunk_rows = min(_CHUNK_ROWS, tile_rows)

    tiles_total = pl.cdiv(rows, tile_rows)
    tiles_per_split = pl.cdiv(tiles_total, _N_SPLITS)
    last_block = tiles_total - 1

    def idx_map(c, i):
        # Clamp so fully-virtual trailing tiles re-read the last real block;
        # their contribution is masked to zero inside the kernel.
        return (jnp.minimum(c * tiles_per_split + i, last_block), 0)

    kernel = functools.partial(
        _focal_kernel, rows=rows, tile_rows=tile_rows,
        chunk_rows=chunk_rows, tiles_per_split=tiles_per_split)

    elems = _N_SPLITS * tiles_per_split * tile_rows * _LANES
    cost = pl.CostEstimate(
        flops=16 * elems,
        transcendentals=3 * elems,   # exp, log1p, exp per element
        bytes_accessed=(x2.size * x2.dtype.itemsize
                        + t2.size * t2.dtype.itemsize
                        + _N_SPLITS * _SUBLANES * _LANES * 4),
    )

    partials = pl.pallas_call(
        kernel,
        out_shape=jax.ShapeDtypeStruct((_N_SPLITS, _SUBLANES, _LANES),
                                       jnp.float32),
        grid=(_N_SPLITS, tiles_per_split),
        in_specs=[
            pl.BlockSpec((tile_rows, _LANES), idx_map),
            pl.BlockSpec((tile_rows, _LANES), idx_map),
        ],
        out_specs=pl.BlockSpec((1, _SUBLANES, _LANES), lambda c, i: (c, 0, 0)),
        compiler_params=pltpu.CompilerParams(
            dimension_semantics=("parallel", "arbitrary"),
        ),
        cost_estimate=cost,
    )(x2, t2)

    # Tiny (2,8,128) reduction + true-N mean in the wrapper.
    return (jnp.sum(partials, dtype=jnp.float32) + tail_sum) / jnp.float32(n)


def _reference(inputs, targets):
    x = inputs.reshape(-1).astype(jnp.float32)
    t = targets.reshape(-1).astype(jnp.float32)
    bce = jnp.maximum(x, 0.0) - x * t + jnp.log1p(jnp.exp(-jnp.abs(x)))
    at = jnp.where(t > 0.5, 1.0 - ALPHA, ALPHA)
    pt = jnp.exp(-bce)
    return jnp.mean(at * (1.0 - pt) ** GAMMA * bce)


if __name__ == "__main__":
    key = jax.random.PRNGKey(0)
    k1, k2, k3, k4, k5, k6 = jax.random.split(key, 6)

    # 1) Pallas path, N not a multiple of 128: exercises the masked partial
    #    tile, the clamped fully-virtual tile of the 2-way split and the tail.
    n1 = 100_037
    x1 = jax.random.normal(k1, (n1,), dtype=jnp.float32) * 3.0
    t1 = jax.random.bernoulli(k2, 0.5, (n1,)).astype(jnp.int8)
    loss1 = jax.block_until_ready(weighted_focal_loss(x1, t1))
    ref1 = _reference(x1, t1)
    assert jnp.allclose(loss1, ref1, rtol=1e-4, atol=1e-6), (loss1, ref1)

    # 2) Pallas path with a large tile + multi-chunk inner loop (all-full tiles).
    n2 = 8192 * _LANES + 77
    x2 = jax.random.normal(k3, (n2,), dtype=jnp.float32)
    t2 = jax.random.bernoulli(k4, 0.3, (n2,)).astype(jnp.int8)
    loss2 = jax.block_until_ready(weighted_focal_loss(x2, t2))
    ref2 = _reference(x2, t2)
    assert jnp.allclose(loss2, ref2, rtol=1e-4, atol=1e-6), (loss2, ref2)

    # 3) Small-N fast path (typical CTGAN discriminator batch).
    n3 = 500
    x3 = jax.random.normal(k5, (n3,), dtype=jnp.float32)
    t3 = jax.random.bernoulli(k6, 0.5, (n3,)).astype(jnp.float32)
    loss3 = jax.block_until_ready(weighted_focal_loss(x3, t3))
    ref3 = _reference(x3, t3)
    assert jnp.allclose(loss3, ref3, rtol=1e-4, atol=1e-6), (loss3, ref3)

    print("KERNEL_OK")
</pallas_src>

<mosaic_0001>
module attributes {stable_mosaic.version = 11 : i64} {
  func.func @_focal_kernel(%arg0: i32, %arg1: i32, %arg2: memref<128x128xf32, #tpu.memory_space<vmem>>, %arg3: memref<128x128xi8, #tpu.memory_space<vmem>>, %arg4: memref<1x8x128xf32, #tpu.memory_space<vmem>>) attributes {dimension_semantics = [#tpu.dimension_semantics<parallel>, #tpu.dimension_semantics<arbitrary>], iteration_bounds = array<i64: 2, 4>, scalar_prefetch = 0 : i64, scratch_operands = 0 : i64, tpu.core_type = #tpu.core_type<tc>, window_params = [{transform_indices = @transform_0, window_bounds = array<i64: 128, 128>}, {transform_indices = @transform_1, window_bounds = array<i64: 128, 128>}, {transform_indices = @transform_2, window_bounds = array<i64: 1, 8, 128>}]} {
    %c0_i32 = arith.constant 0 : i32
    %0 = arith.cmpi eq, %arg1, %c0_i32 : i32
    %1 = arith.extui %0 : i1 to i32
    %c0_i32_0 = arith.constant 0 : i32
    %2 = arith.cmpi ne, %1, %c0_i32_0 : i32
    scf.if %2 {
      %cst = arith.constant 0.000000e+00 : f32
      %13 = vector.broadcast %cst : f32 to vector<1x8x128xf32>
      %c0 = arith.constant 0 : index
      %c0_4 = arith.constant 0 : index
      %c0_5 = arith.constant 0 : index
      %14 = vector.load %arg4[%c0, %c0_4, %c0_5] : memref<1x8x128xf32, #tpu.memory_space<vmem>>, vector<1x8x128xf32>
      tpu.vector_store %arg4[%c0, %c0_4, %c0_5], %13 {strides = array<i32>} : memref<1x8x128xf32, #tpu.memory_space<vmem>>, vector<1x8x128xf32>,
    } else {
    }
    %c4_i32 = arith.constant 4 : i32
    %3 = arith.muli %arg0, %c4_i32 : i32
    %4 = arith.addi %3, %arg1 : i32
    %c128_i32 = arith.constant 128 : i32
    %5 = arith.muli %4, %c128_i32 : i32
    %c128_i32_1 = arith.constant 128 : i32
    %6 = arith.addi %5, %c128_i32_1 : i32
    %c781_i32 = arith.constant 781 : i32
    %7 = arith.cmpi sle, %6, %c781_i32 : i32
    %8 = arith.extui %7 : i1 to i32
    %c0_i32_2 = arith.constant 0 : i32
    %9 = arith.cmpi ne, %8, %c0_i32_2 : i32
    scf.if %9 {
      %c0_i32_4 = arith.constant 0 : i32
      %c128_i32_5 = arith.constant 128 : i32
      %13 = arith.muli %c0_i32_4, %c128_i32_5 : i32
      %14 = tpu.assume_multiple %13, 128 : i32
      %15 = arith.index_cast %14 : i32 to index
      %c0 = arith.constant 0 : index
      %16 = vector.load %arg2[%15, %c0] : memref<128x128xf32, #tpu.memory_space<vmem>>, vector<128x128xf32>
      %17 = arith.index_cast %14 : i32 to index
      %c0_6 = arith.constant 0 : index
      %18 = vector.load %arg3[%17, %c0_6] : memref<128x128xi8, #tpu.memory_space<vmem>>, vector<128x128xi8>
      %19 = arith.sitofp %18 : vector<128x128xi8> to vector<128x128xf32>
      %20 = math.absf %16 : vector<128x128xf32>
      %cst = arith.constant 0.000000e+00 : f32
      %21 = vector.broadcast %cst : f32 to vector<128x128xf32>
      %22 = arith.subf %21, %20 : vector<128x128xf32>
      %23 = math.exp %22 : vector<128x128xf32>
      %cst_7 = arith.constant 0.000000e+00 : f32
      %24 = vector.broadcast %cst_7 : f32 to vector<128x128xf32>
      %25 = arith.maximumf %16, %24 : vector<128x128xf32>
      %26 = arith.mulf %16, %19 : vector<128x128xf32>
      %27 = arith.subf %25, %26 : vector<128x128xf32>
      %28 = math.log1p %23 : vector<128x128xf32>
      %29 = arith.addf %27, %28 : vector<128x128xf32>
      %cst_8 = arith.constant 0.000000e+00 : f32
      %30 = vector.broadcast %cst_8 : f32 to vector<128x128xf32>
      %31 = arith.subf %30, %29 : vector<128x128xf32>
      %32 = math.exp %31 : vector<128x128xf32>
      %cst_9 = arith.constant 1.000000e+00 : f32
      %33 = vector.broadcast %cst_9 : f32 to vector<128x128xf32>
      %34 = arith.subf %33, %32 : vector<128x128xf32>
      %cst_10 = arith.constant 5.000000e-01 : f32
      %35 = vector.broadcast %cst_10 : f32 to vector<128x128xf32>
      %36 = arith.mulf %35, %19 : vector<128x128xf32>
      %cst_11 = arith.constant 2.500000e-01 : f32
      %37 = vector.broadcast %cst_11 : f32 to vector<128x128xf32>
      %38 = arith.addf %37, %36 : vector<128x128xf32>
      %39 = arith.mulf %34, %34 : vector<128x128xf32>
      %40 = arith.mulf %38, %39 : vector<128x128xf32>
      %41 = arith.mulf %40, %29 : vector<128x128xf32>
      %c0_12 = arith.constant 0 : index
      %c0_13 = arith.constant 0 : index
      %c0_14 = arith.constant 0 : index
      %42 = vector.load %arg4[%c0_12, %c0_13, %c0_14] : memref<1x8x128xf32, #tpu.memory_space<vmem>>, vector<1x8x128xf32>
      %43 = vector.shape_cast %42 : vector<1x8x128xf32> to vector<8x128xf32>
      %44 = vector.shape_cast %41 : vector<128x128xf32> to vector<16x8x128xf32>
      %cst_15 = arith.constant dense<0.000000e+00> : vector<8x128xf32>
      %45 = vector.multi_reduction <add>, %44, %cst_15 [0] : vector<16x8x128xf32> to vector<8x128xf32>
      %46 = arith.addf %43, %45 : vector<8x128xf32>
      %c0_16 = arith.constant 0 : index
      %c0_17 = arith.constant 0 : index
      %c0_18 = arith.constant 0 : index
      %47 = vector.load %arg4[%c0_16, %c0_17, %c0_18] : memref<1x8x128xf32, #tpu.memory_space<vmem>>, vector<1x8x128xf32>
      %48 = vector.shape_cast %47 : vector<1x8x128xf32> to vector<8x128xf32>
      %49 = vector.shape_cast %46 : vector<8x128xf32> to vector<1x8x128xf32>
      tpu.vector_store %arg4[%c0_16, %c0_17, %c0_18], %49 {strides = array<i32>} : memref<1x8x128xf32, #tpu.memory_space<vmem>>, vector<1x8x128xf32>,
      %c1_i32 = arith.constant 1 : i32
    } else {
    }
    %true = arith.constant true
    %10 = arith.xori %7, %true : i1
    %11 = arith.extui %10 : i1 to i32
    %c0_i32_3 = arith.constant 0 : i32
    %12 = arith.cmpi ne, %11, %c0_i32_3 : i32
    scf.if %12 {
      %c0_i32_4 = arith.constant 0 : i32
      %c128_i32_5 = arith.constant 128 : i32
      %13 = arith.muli %c0_i32_4, %c128_i32_5 : i32
      %14 = tpu.assume_multiple %13, 128 : i32
      %15 = arith.index_cast %14 : i32 to index
      %c0 = arith.constant 0 : index
      %16 = vector.load %arg2[%15, %c0] : memref<128x128xf32, #tpu.memory_space<vmem>>, vector<128x128xf32>
      %17 = arith.index_cast %14 : i32 to index
      %c0_6 = arith.constant 0 : index
      %18 = vector.load %arg3[%17, %c0_6] : memref<128x128xi8, #tpu.memory_space<vmem>>, vector<128x128xi8>
      %19 = arith.sitofp %18 : vector<128x128xi8> to vector<128x128xf32>
      %20 = math.absf %16 : vector<128x128xf32>
      %cst = arith.constant 0.000000e+00 : f32
      %21 = vector.broadcast %cst : f32 to vector<128x128xf32>
      %22 = arith.subf %21, %20 : vector<128x128xf32>
      %23 = math.exp %22 : vector<128x128xf32>
      %cst_7 = arith.constant 0.000000e+00 : f32
      %24 = vector.broadcast %cst_7 : f32 to vector<128x128xf32>
      %25 = arith.maximumf %16, %24 : vector<128x128xf32>
      %26 = arith.mulf %16, %19 : vector<128x128xf32>
      %27 = arith.subf %25, %26 : vector<128x128xf32>
      %28 = math.log1p %23 : vector<128x128xf32>
      %29 = arith.addf %27, %28 : vector<128x128xf32>
      %cst_8 = arith.constant 0.000000e+00 : f32
      %30 = vector.broadcast %cst_8 : f32 to vector<128x128xf32>
      %31 = arith.subf %30, %29 : vector<128x128xf32>
      %32 = math.exp %31 : vector<128x128xf32>
      %cst_9 = arith.constant 1.000000e+00 : f32
      %33 = vector.broadcast %cst_9 : f32 to vector<128x128xf32>
      %34 = arith.subf %33, %32 : vector<128x128xf32>
      %cst_10 = arith.constant 5.000000e-01 : f32
      %35 = vector.broadcast %cst_10 : f32 to vector<128x128xf32>
      %36 = arith.mulf %35, %19 : vector<128x128xf32>
      %cst_11 = arith.constant 2.500000e-01 : f32
      %37 = vector.broadcast %cst_11 : f32 to vector<128x128xf32>
      %38 = arith.addf %37, %36 : vector<128x128xf32>
      %39 = arith.mulf %34, %34 : vector<128x128xf32>
      %40 = arith.mulf %38, %39 : vector<128x128xf32>
      %41 = arith.mulf %40, %29 : vector<128x128xf32>
      %42 = arith.addi %5, %14 : i32
      %43 = tpu.iota {dimensions = array<i32: 0>} : vector<128x128xi32>
      %44 = vector.broadcast %42 : i32 to vector<128x128xi32>
      %45 = arith.addi %44, %43 : vector<128x128xi32>
      %c781_i32_12 = arith.constant 781 : i32
      %46 = vector.broadcast %c781_i32_12 : i32 to vector<128x128xi32>
      %47 = arith.cmpi slt, %45, %46 : vector<128x128xi32>
      %cst_13 = arith.constant 0.000000e+00 : f32
      %48 = vector.broadcast %cst_13 : f32 to vector<128x128xf32>
      %49 = arith.select %47, %41, %48 : vector<128x128xi1>, vector<128x128xf32>
      %c0_14 = arith.constant 0 : index
      %c0_15 = arith.constant 0 : index
      %c0_16 = arith.constant 0 : index
      %50 = vector.load %arg4[%c0_14, %c0_15, %c0_16] : memref<1x8x128xf32, #tpu.memory_space<vmem>>, vector<1x8x128xf32>
      %51 = vector.shape_cast %50 : vector<1x8x128xf32> to vector<8x128xf32>
      %52 = vector.shape_cast %49 : vector<128x128xf32> to vector<16x8x128xf32>
      %cst_17 = arith.constant dense<0.000000e+00> : vector<8x128xf32>
      %53 = vector.multi_reduction <add>, %52, %cst_17 [0] : vector<16x8x128xf32> to vector<8x128xf32>
      %54 = arith.addf %51, %53 : vector<8x128xf32>
      %c0_18 = arith.constant 0 : index
      %c0_19 = arith.constant 0 : index
      %c0_20 = arith.constant 0 : index
      %55 = vector.load %arg4[%c0_18, %c0_19, %c0_20] : memref<1x8x128xf32, #tpu.memory_space<vmem>>, vector<1x8x128xf32>
      %56 = vector.shape_cast %55 : vector<1x8x128xf32> to vector<8x128xf32>
      %57 = vector.shape_cast %54 : vector<8x128xf32> to vector<1x8x128xf32>
      tpu.vector_store %arg4[%c0_18, %c0_19, %c0_20], %57 {strides = array<i32>} : memref<1x8x128xf32, #tpu.memory_space<vmem>>, vector<1x8x128xf32>,
      %c1_i32 = arith.constant 1 : i32
    } else {
    }
    return
  }
  func.func @transform_0(%arg0: i32, %arg1: i32) -> (i32, i32) {
    %c4_i32 = arith.constant 4 : i32
    %0 = arith.muli %arg0, %c4_i32 : i32
    %1 = arith.addi %0, %arg1 : i32
    %c6_i32 = arith.constant 6 : i32
    %2 = arith.minsi %1, %c6_i32 : i32
    %c0_i32 = arith.constant 0 : i32
    %c0_i32_0 = arith.constant 0 : i32
    return %2, %c0_i32 : i32, i32
  }
  func.func @transform_1(%arg0: i32, %arg1: i32) -> (i32, i32) {
    %c4_i32 = arith.constant 4 : i32
    %0 = arith.muli %arg0, %c4_i32 : i32
    %1 = arith.addi %0, %arg1 : i32
    %c6_i32 = arith.constant 6 : i32
    %2 = arith.minsi %1, %c6_i32 : i32
    %c0_i32 = arith.constant 0 : i32
    %c0_i32_0 = arith.constant 0 : i32
    return %2, %c0_i32 : i32, i32
  }
  func.func @transform_2(%arg0: i32, %arg1: i32) -> (i32, i32, i32) {
    %c0_i32 = arith.constant 0 : i32
    %c0_i32_0 = arith.constant 0 : i32
    %c0_i32_1 = arith.constant 0 : i32
    return %arg0, %c0_i32, %c0_i32_0 : i32, i32, i32
  }
}

</mosaic_0001>

<bundles_post_ra>
// kernel: tpu_custom_call.1
= control target key start
LH: loop header
LB: loop body
LE: loop exit
PB: predicated region body
PF: predicated region fallthrough
CT: control target
= control target key end

     0   :  { %s3654_s0 = inlined_call_operand.hbm [shape: f32[781,128], index: 0, kind: input, shape index: {}]   ;;  %s3655_s1 = inlined_call_operand.hbm [shape: s8[781,128], index: 1, kind: input, shape index: {}]   ;;  %s3656_s2 = inlined_call_operand.hbm [shape: f32[2,8,128], index: 2, kind: output, shape index: {}]  }
   0x1   :  { %3690 = sst [smem:[#allocation52_spill]] %s3654_s0 }
   0x2   :  { %7 = vsyncpa [#allocation3], 0 }
   0x3   :  { %9 = vsyncpa [#allocation3 + $0x1], 0 }
   0x4   :  { %10 = vsyncpa [#allocation6], 0 }
   0x5   :  { %12 = vsyncpa [#allocation6 + $0x1], 0 }
   0x6   :  { %13 = vsyncpa [#allocation4], 0 }
   0x7   :  { %15 = vsyncpa [#allocation4 + $0x1], 0  ;;  %s2113_s9 = smov 0   ;;  %s2115_s10 = smov 0  }
   0x8   :  { %s2117_s11 = smov 0   ;;  %s2119_s12 = smov 0  }
   0x9   :  { %s2121_s13 = smov 0   ;;  %s2123_s14 = smov 0  }
   0xa   :  { %s2125_s15 = smov 0   ;;  %s2127_s16 = smov 0  }
   0xb   :  { %s2129_s17 = smov 0   ;;  %s2131_s18 = smov 0  }
   0xc   :  { %s2133_s19 = smov 0  }
   0xd LB: > { %3691 = sst [smem:[#allocation11_spill]] %s2081_s17  ;;  %s1474_s20 = sadd.s32 4294967295, %s2089_s19   ;;  %s2089_s19 = sphi %s2133_s19, %s21_s19   ;;  %s2085_s18 = sphi %s2131_s18, %s3855_s18   ;;  %s2081_s17 = sphi %s2129_s17, %s3854_s17   ;;  %s2077_s16 = sphi %s2127_s16, %s3853_s16   ;;  %s2073_s15 = sphi %s2125_s15, %s3852_s15   ;;  %s2069_s14 = sphi %s2123_s14, %s3861_s14   ;;  %s2065_s13 = sphi %s2121_s13, %s3860_s13   ;;  %s2061_s12 = sphi %s2119_s12, %s3859_s12   ;;  %s2057_s11 = sphi %s2117_s11, %s3858_s11   ;;  %s2053_s10 = sphi %s2115_s10, %s3857_s10   ;;  %s2049_s9 = sphi %s2113_s9, %s3856_s9  }
   0xe   : > { %3692 = sst [smem:[#allocation12_spill]] %s2085_s18  ;;  %s1475_s21 = sadd.s32 4294967294, %s2089_s19  }
   0xf   : > { %s30_s22 = sadd.s32 1, %s2081_s17  ;;  %s33_s23 = sadd.s32 1, %s2085_s18 }
  0x10   : > { %p31_p0 = scmp.ge.s32.totalorder %s30_s22, 4  ;;  %s1476_s24 = sshll.u32 %s2085_s18, 2 }
  0x11   : > { %s38_s25 = sadd.s32 %s2081_s17, %s1476_s24  ;;  %s48_s26 = sadd.s32 1, %s2069_s14 }
  0x12   : > { %s3863_s22 = smov (%p31_p0, %s30_s22), 0  ;;  %s3865_s23 = smov (!%p31_p0, %s33_s23), %s2085_s18 }
  0x13   : > { %3693 = sst [smem:[#allocation13_spill]] %s3863_s22  ;;  %p39_p1 = scmp.lt.s32.totalorder %s38_s25, 6 }
  0x14   : > { %p55_p2 = scmp.ne.s32.totalorder %s2069_s14, %s2065_s13  ;;  %p35_p3 = scmp.ge.s32.totalorder %s3865_s23, 2 }
  0x15   : > { %p56_p4 = scmp.eq.s32.totalorder %s2089_s19, 0  ;;  %s3867_s25 = smov (!%p39_p1, %s38_s25), 6 }
  0x16   : > { %s3869_s23 = smov (%p35_p3, %s3865_s23), 0  ;;  %p61_p6 = scmp.ne.s32.totalorder %s2065_s13, %s2061_s12 }
  0x17   : > { %3694 = sst [smem:[#allocation14_spill]] %s3869_s23  ;;  %p2185_p5 = por %p56_p4, %p55_p2 }
  0x18   : > { %s1477_s28 = sshll.u32 %s3869_s23, 2  ;;  %p62_p7 = scmp.eq.s32.totalorder %s1474_s20, 0 }
  0x19   : > { %s42_s29 = sadd.s32 %s1477_s28, %s3863_s22  ;;  %s105_s30 = ssub.s32 %s2085_s18, %s3869_s23 }
  0x1a   : > { %p43_p8 = scmp.lt.s32.totalorder %s42_s29, 6  ;;  %p2197_p9 = por %p62_p7, %p61_p6 }
  0x1b   : > { %p106_p10 = scmp.eq.s32.totalorder %s105_s30, 0  ;;  %s108_s4 = sadd.s32 1, %s2057_s11 }
  0x1c   : > { %s3871_s29 = smov (!%p43_p8, %s42_s29), 6  ;;  %p118_p11 = scmp.ne.s32.totalorder %s2057_s11, %s2053_s10 }
  0x1d   : > { %s2203_s5 = scalar_select %p106_p10, %s2057_s11, %s108_s4  }
  0x1e   : > { %s45_s6 = ssub.s32 %s3867_s25, %s3871_s29  ;;  %p119_p13 = scmp.eq.s32.totalorder %s1474_s20, 7 }
  0x1f   : > { %p46_p12 = scmp.eq.s32.totalorder %s45_s6, 0  ;;  %p124_p0 = scmp.ne.s32.totalorder %s2053_s10, %s2049_s9 }
  0x20   : > { %p125_p1 = scmp.eq.s32.totalorder %s1475_s21, 7  ;;  %p2217_p2 = por %p119_p13, %p118_p11 }
  0x21   : > { %s2215_s7 = scalar_select %p46_p12, %s2069_s14, %s48_s26  }
  0x22   : > { %p2221_p3 = por %p125_p1, %p124_p0  ;;  %p1481_p4 = scmp.ge.s32.totalorder %s2089_s19, 8 }
  0x23   : > { %3697 = sst [smem:[#allocation15_spill]] %s2215_s7 }
  0x24   : > { %141 = sbr.rel (%p1481_p4) target bundleno = 120 (0x78), region = 16 }
  0x29   : > { %144 = sbr.rel (!%p2185_p5) target bundleno = 84 (0x54), region = 20  ;;  %s145_s20 = sand.u32 (%p2185_p5), 1, %s2069_s14  }
  0x2a   : > { %s1484_s21 = sshll.u32 (%p2185_p5), %s3867_s25, 4  ;;  %s1482_s24 = sshll.u32 (%p2185_p5), %s145_s20, 7 }
  0x2b   : > { %s155_s26 = ssub.s32 (%p2185_p5), 98, %s1484_s21  ;;  %s2233_s4 = scalar_lea.sflag (%p2185_p5), [#allocation3], %s145_s20 }
  0x2c   : > { %p156_p6 = scmp.lt.s32.totalorder (%p2185_p5), %s155_s26, 16  ;;  %s149_s6 = scalar_lea.vmem (%p2185_p5), [#allocation2], %s1482_s24 }
  0x2e   : > { %s3873_s26 = smov (!%p156_p6, %s155_s26), 16 }
  0x2f   : > { %s1485_s28 = sshll.u32 %s3873_s26, 3 }
  0x30   : > { %s159_s29 = ssub.s32 128, %s1485_s28 }
  0x31   : > { %s160_s30 = sshll.u32 %s159_s29, 4 }
  0x32   : > { %161 = vsyncadd %s2233_s4, %s160_s30  ;;  %p2236_p7 = scmp.ne.s32.totalorder %s1485_s28, 0  ;;  %s1511_s21 = sshll.u32 %s3867_s25, 7 }
  0x33   : > { %s3701_s0 = sld [smem:[#allocation52_spill]]  ;;  %s2244_s7 = sshll.u32 %s149_s6, 4  ;;  %s169_s7 = int_to_ptr.vmem [resolvable:$true] %s2244_s7 }
  0x34   : > { %s3661_s24 = sshll.u32 %s3873_s26, 7 }
  0x35   : > { %s1887_s28 = sshrl.u32 %s3661_s24, 4 }
  0x39   : > { %s164_s17 = scalar_lea.hbm %s3701_s0, %s1511_s21  ;;  %s1896_s6 = scalar_lea.hbm %s3701_s0, 784 }
  0x3a   : > { %s166_s20 = sshll.u32 %s164_s17, 4  ;;  %s2247_s20 = int_to_ptr.hbm [resolvable:$true] %s166_s20 }
  0x3b   : > { %s1885_s29 = sshra.s32 %s2247_s20, 4  ;;  %s1886_s29 = int_to_ptr.hbm [resolvable:$true] %s1885_s29 }
  0x3c   : > { %s1892_s30 = scalar_lea.hbm %s1886_s29, %s1887_s28 }
  0x3d   : > { %p1893_p8 = scmp.ne.s32.totalorder %s1886_s29, %s1892_s30  ;;  %p1898_p12 = scmp.lt.s32.totalorder %s1896_s6, %s1892_s30 }
  0x3f   : > { %p1894_p10 = pnand %p1893_p8, %p2236_p7 }
  0x41   : > { %p1895_p11 = pneg %p1894_p10 }
  0x43   : > { %p1900_p13 = pnand %p1898_p12, %p1895_p11 }
  0x45   : > { %1903 = shalt.err (!%p1900_p13)
}
  0x46   : > { %s1904_s17 = sshra.s32 %s169_s7, 4  ;;  %s2091_s29 = smov [#allocation2]   ;;  %s1905_s17 = int_to_ptr.vmem [resolvable:$true] %s1904_s17 }
  0x47   : > { %s1911_s21 = scalar_lea.vmem %s1905_s17, %s1887_s28  ;;  %s1915_s24 = scalar_lea.vmem %s2091_s29, 256 }
  0x48   : > { %p1912_p0 = scmp.ne.s32.totalorder %s1905_s17, %s1911_s21  ;;  %p1917_p6 = scmp.lt.s32.totalorder %s1915_s24, %s1911_s21 }
  0x4a   : > { %p1913_p1 = pnand %p1912_p0, %p2236_p7 }
  0x4c   : > { %p1914_p4 = pneg %p1913_p1 }
  0x4e   : > { %p1919_p8 = pnand %p1917_p6, %p1914_p4 }
  0x50   : > { %1922 = shalt.err (!%p1919_p8)
}
  0x51   : > { %s2092_s18 = smov 128   ;;  %s2093_s30 = smov 8  }
  0x52   : > { %s3702_s22 = sshll.u32 %s3873_s26, 7 }
  0x53   : > { %174 = dma.hbm_to_vmem [thread:$0]  (%p2236_p7), %s2247_s20, %s3702_s22, %s169_s7, %s2233_s4, %s2092_s18, %s2092_s18, %s2093_s30  }
  0x54 PF: > { %177 = sbr.rel (!%p2185_p5) target bundleno = 120 (0x78), region = 24  ;;  %s178_s24 = sand.u32 (%p2185_p5), 1, %s2069_s14  }
  0x55   : > { %s1492_s28 = sshll.u32 (%p2185_p5), %s3867_s25, 4  ;;  %s1490_s6 = sshll.u32 (%p2185_p5), %s178_s24, 5 }
  0x56   : > { %s188_s17 = ssub.s32 (%p2185_p5), 98, %s1492_s28  ;;  %s2277_s0 = scalar_lea.sflag (%p2185_p5), [#allocation6], %s178_s24 }
  0x57   : > { %p189_p10 = scmp.lt.s32.totalorder (%p2185_p5), %s188_s17, 16  ;;  %s182_s7 = scalar_lea.vmem (%p2185_p5), [#allocation5], %s1490_s6 }
  0x59   : > { %s3875_s17 = smov (!%p189_p10, %s188_s17), 16 }
  0x5a   : > { %s1493_s21 = sshll.u32 %s3875_s17, 1 }
  0x5b   : > { %s192_s29 = ssub.s32 32, %s1493_s21 }
  0x5c   : > { %s193_s23 = sshll.u32 %s192_s29, 4 }
  0x5d   : > { %194 = vsyncadd %s2277_s0, %s193_s23  ;;  %p2280_p5 = scmp.ne.s32.totalorder %s1493_s21, 0  ;;  %s1512_s26 = sshll.u32 %s3867_s25, 5 }
  0x5e   : > { %s197_s18 = scalar_lea.hbm %s3655_s1, %s1512_s26  ;;  %s2288_s30 = sshll.u32 %s182_s7, 4  ;;  %s202_s30 = int_to_ptr.vmem [resolvable:$true] %s2288_s30 }
  0x5f   : > { %s199_s22 = sshll.u32 %s197_s18, 4  ;;  %s1497_s24 = sshll.u32 %s3875_s17, 5  ;;  %s2291_s22 = int_to_ptr.hbm [resolvable:$true] %s199_s22 }
  0x60   : > { %s1924_s28 = sshra.s32 %s2291_s22, 4  ;;  %s1926_s6 = sshrl.u32 %s1497_s24, 4  ;;  %s1925_s28 = int_to_ptr.hbm [resolvable:$true] %s1924_s28 }
  0x61   : > { %s1931_s21 = scalar_lea.hbm %s1925_s28, %s1926_s6  ;;  %s1935_s23 = scalar_lea.hbm %s3655_s1, 196 }
  0x62   : > { %p1932_p7 = scmp.ne.s32.totalorder %s1925_s28, %s1931_s21  ;;  %p1937_p13 = scmp.lt.s32.totalorder %s1935_s23, %s1931_s21 }
  0x64   : > { %p1933_p11 = pnand %p1932_p7, %p2280_p5 }
  0x66   : > { %p1934_p12 = pneg %p1933_p11 }
  0x68   : > { %p1939_p0 = pnand %p1937_p13, %p1934_p12 }
  0x6a   : > { %1942 = shalt.err (!%p1939_p0)
}
  0x6b   : > { %s1943_s7 = sshra.s32 %s202_s30, 4  ;;  %s2094_s4 = smov [#allocation5]   ;;  %s1944_s7 = int_to_ptr.vmem [resolvable:$true] %s1943_s7 }
  0x6c   : > { %s1950_s26 = scalar_lea.vmem %s1944_s7, %s1926_s6  ;;  %s1954_s20 = scalar_lea.vmem %s2094_s4, 64 }
  0x6d   : > { %p1951_p1 = scmp.ne.s32.totalorder %s1944_s7, %s1950_s26  ;;  %p1956_p8 = scmp.lt.s32.totalorder %s1954_s20, %s1950_s26 }
  0x6f   : > { %p1952_p4 = pnand %p1951_p1, %p2280_p5 }
  0x71   : > { %p1953_p6 = pneg %p1952_p4 }
  0x73   : > { %p1958_p10 = pnand %p1956_p8, %p1953_p6 }
  0x75   : > { %1961 = shalt.err (!%p1958_p10)
}
  0x76   : > { %s2095_s18 = smov 32   ;;  %s2096_s28 = smov 2  }
  0x77   : > { %207 = dma.hbm_to_vmem [thread:$0]  (%p2280_p5), %s2291_s22, %s1497_s24, %s202_s30, %s2277_s0, %s2095_s18, %s2095_s18, %s2096_s28  }
  0x78 PF: > { %p1498_p7 = scmp.ge.s32.totalorder %s2089_s19, 1  ;;  %p209_p11 = scmp.lt.s32.totalorder %s2089_s19, 9 }
  0x7a   : > { %p210_p12 = pnand %p1498_p7, %p209_p11 }
  0x7b   : > { %s215_s6 = sand.u32 (!%p210_p12), 1, %s2065_s13  }
  0x7c   : > { %213 = sbr.rel (%p210_p12) target bundleno = 457 (0x1c9), region = 28  ;;  %s1499_s21 = sshll.u32 (!%p210_p12), %s215_s6, 7 }
  0x7d   : > { %s216_s25 = scalar_lea.sflag (!%p210_p12), [#allocation3], %s215_s6  ;;  %s2317_s29 = scalar_lea.vmem (!%p210_p12), [#allocation2], %s1499_s21 }
  0x81   : > { %2036 = dma.done.wait (%p2197_p9), %s216_s25, 2048  }
  0x82   : > { %2038 = vsyncadd (%p2197_p9), %s216_s25, 4294965248  ;;  %s1500_s0 = sshll.u32 %s215_s6, 5  ;;  %s226_s17 = scalar_lea.sflag [#allocation6], %s215_s6 }
  0x83   : > { %s2323_s27 = scalar_lea.vmem [#allocation5], %s1500_s0 }
  0x84   : > { %2040 = dma.done.wait (%p2197_p9), %s226_s17, 512  }
  0x85   : > { %2042 = vsyncadd (%p2197_p9), %s226_s17, 4294966784  ;;  %s253_s30 = sand.u32 1, %s2053_s10   ;;  %p1502_p5 = scmp.ne.s32.totalorder %s2073_s15, 0 }
  0x86   : > { %s1501_s22 = sshll.u32 %s253_s30, 3 }
  0x87   : > { %s2332_s24 = scalar_lea.vmem [#allocation7], %s1501_s22  ;;  %277 = sbr.rel (%p1502_p5) target bundleno = 142 (0x8e), region = 40 }
  0x8c   : > { %v2097_v0 = vmov 0.0  }
  0x8d   : > { %278 = vst [vmem:[%s2332_s24] sm:$0xff] %v2097_v0 }
  0x8e PF: > { %s1503_s23 = sshll.u32 %s2077_s16, 2 }
  0x8f   : > { %s2338_s7 = sadd.s32 %s2073_s15, %s1503_s23 }
  0x90   : > { %s1504_s3 = sshll.u32 %s2338_s7, 7 }
  0x91   : > { %s2343_s26 = sadd.s32 128, %s1504_s3 }
  0x92   : > { %p1505_p9 = scmp.gt.s32.totalorder %s2343_s26, 781 }
  0x94   : > { %286 = sbr.rel (%p1505_p9) target bundleno = 288 (0x120), region = 44 }
  0x99   : > { %v2347_v1 = vld [vmem:[%s2317_s29] sm:$0xff]  ;;  %v2350_v2 = vld [vmem:[%s2317_s29 + $0x8] sm:$0xff]  ;;  %v2353_v3 = vld [vmem:[%s2317_s29 + $0x10] sm:$0xff] }
  0x9a   : > { %v2356_v4 = vld [vmem:[%s2317_s29 + $0x18] sm:$0xff]  ;;  %v351_v5 = vand.u32 2147483647, %v2347_v1  ;;  %v352_v6 = vand.u32 2147483647, %v2350_v2  ;;  %v2362_v8 = vld [vmem:[%s2317_s29 + $0x20] sm:$0xff] }
  0x9b   : > { %v353_v7 = vand.u32 2147483647, %v2353_v3  ;;  %v1514_v9 = vld [vmem:[%s2323_s27] sm:$0xff]   ;;  %v1578_v10 = vld [vmem:[%s2323_s27 + $0x8] sm:$0xff]   ;;  %v354_v11 = vand.u32 2147483647, %v2356_v4 }
  0x9c   : > { %v1580_v12 = vld [vmem:[%s2323_s27 + $0x10] sm:$0xff]   ;;  %v355_v13 = vand.u32 2147483647, %v2362_v8  ;;  %v2369_v14 = vsub.f32 0.0, %v351_v5  ;;  %v2371_v15 = vsub.f32 0.0, %v352_v6  ;;  %v1515_v17 = vunpack.c.0.s8 %v1514_v9  ;;  %v1582_v21 = vld [vmem:[%s2323_s27 + $0x18] sm:$0xff]  }
  0x9d   : > { %v2373_v16 = vsub.f32 0.0, %v353_v7  ;;  %v1516_v18 = vunpack.c.1.s8 %v1514_v9  ;;  %v1519_v19 = vunpack.c.2.s8 %v1514_v9  ;;  %v1520_v20 = vunpack.c.3.s8 %v1514_v9  ;;  %v2377_v34 = vld [vmem:[%s2317_s29 + $0x28] sm:$0xff]  ;;  %v2380_v35 = vld [vmem:[%s2317_s29 + $0x30] sm:$0xff]  ;;  %v2391_v40 = vld [vmem:[%s2317_s29 + $0x38] sm:$0xff] }
  0x9e   : > { %v1523_v22 = vunpack.c.0.s8 %v1578_v10  ;;  %v1524_v23 = vunpack.c.1.s8 %v1578_v10  ;;  %v1527_v24 = vunpack.c.2.s8 %v1578_v10  ;;  %v1528_v25 = vunpack.c.3.s8 %v1578_v10  ;;  %v2394_v41 = vld [vmem:[%s2317_s29 + $0x40] sm:$0xff]  ;;  %v2397_v42 = vld [vmem:[%s2317_s29 + $0x48] sm:$0xff]  ;;  %v2408_v47 = vld [vmem:[%s2317_s29 + $0x50] sm:$0xff] }
  0x9f   : > { %v1531_v26 = vunpack.c.0.s8 %v1580_v12  ;;  %v1532_v27 = vunpack.c.1.s8 %v1580_v12  ;;  %v1535_v28 = vunpack.c.2.s8 %v1580_v12  ;;  %v1536_v29 = vunpack.c.3.s8 %v1580_v12  ;;  %v2411_v48 = vld [vmem:[%s2317_s29 + $0x58] sm:$0xff]  ;;  %v2414_v49 = vld [vmem:[%s2317_s29 + $0x60] sm:$0xff]  ;;  %v2425_v54 = vld [vmem:[%s2317_s29 + $0x68] sm:$0xff] }
  0xa0   : > { %v1539_v30 = vunpack.c.0.s8 %v1582_v21  ;;  %v1540_v31 = vunpack.c.1.s8 %v1582_v21  ;;  %v1543_v32 = vunpack.c.2.s8 %v1582_v21  ;;  %v1544_v33 = vunpack.c.3.s8 %v1582_v21  ;;  %v2428_v55 = vld [vmem:[%s2317_s29 + $0x70] sm:$0xff]  ;;  %v2431_v56 = vld [vmem:[%s2317_s29 + $0x78] sm:$0xff] }
  0xa1   : > { %v2382_v36 = vcvt.s32.f32 %v1515_v17  ;;  %v2384_v37 = vcvt.s32.f32 %v1516_v18  ;;  %v2386_v38 = vcvt.s32.f32 %v1519_v19  ;;  %v2388_v39 = vcvt.s32.f32 %v1520_v20 }
  0xa2   : > { %v2399_v43 = vcvt.s32.f32 %v1523_v22  ;;  %v2401_v44 = vcvt.s32.f32 %v1524_v23  ;;  %v2403_v45 = vcvt.s32.f32 %v1527_v24  ;;  %v2405_v46 = vcvt.s32.f32 %v1528_v25 }
  0xa3   : > { %3704 = vst [vmem:[#allocation16_spill] sm:$0xff] %v2382_v36  ;;  %v2416_v50 = vcvt.s32.f32 %v1531_v26  ;;  %v2418_v51 = vcvt.s32.f32 %v1532_v27  ;;  %v2420_v52 = vcvt.s32.f32 %v1535_v28  ;;  %v2422_v53 = vcvt.s32.f32 %v1536_v29 }
  0xa4   : > { %3705 = vst [vmem:[#allocation17_spill] sm:$0xff] %v2384_v37  ;;  %v2433_v57 = vcvt.s32.f32 %v1539_v30  ;;  %v2435_v58 = vcvt.s32.f32 %v1540_v31  ;;  %v2437_v59 = vcvt.s32.f32 %v1543_v32  ;;  %v2439_v60 = vcvt.s32.f32 %v1544_v33 }
  0xa5   : > { %3706 = vst [vmem:[#allocation18_spill] sm:$0xff] %v2386_v38  ;;  %v356_v61 = vand.u32 2147483647, %v2377_v34  ;;  %v357_v62 = vand.u32 2147483647, %v2380_v35  ;;  %v2446_v0 = vmul.f32 %v2382_v36, %v2347_v1  ;;  %v2453_v9 = vmul.f32 %v2384_v37, %v2350_v2 }
  0xa6   : > { %3707 = vst [vmem:[#allocation19_spill] sm:$0xff] %v2405_v46  ;;  %v358_v63 = vand.u32 2147483647, %v2391_v40  ;;  %v359_v5 = vand.u32 2147483647, %v2394_v41  ;;  %v2460_v18 = vmul.f32 %v2386_v38, %v2353_v3  ;;  %v370_v21 = vsub.f32 0.0, %v354_v11 }
  0xa7   : > { %3708 = vst [vmem:[#allocation20_spill] sm:$0xff] %v2416_v50  ;;  %v360_v6 = vand.u32 2147483647, %v2397_v42  ;;  %v361_v7 = vand.u32 2147483647, %v2408_v47  ;;  %v371_v22 = vsub.f32 0.0, %v355_v13  ;;  %v2471_v11 = vmul.f32 %v2388_v39, %v2356_v4 }
  0xa8   : > { %3709 = vst [vmem:[#allocation21_spill] sm:$0xff] %v2418_v51  ;;  %v362_v10 = vand.u32 2147483647, %v2411_v48  ;;  %v363_v12 = vand.u32 2147483647, %v2414_v49  ;;  %v372_v23 = vsub.f32 0.0, %v356_v61 }
  0xa9   : > { %3710 = vst [vmem:[#allocation22_spill] sm:$0xff] %v2420_v52  ;;  %v364_v17 = vand.u32 2147483647, %v2425_v54  ;;  %v365_v19 = vand.u32 2147483647, %v2428_v55  ;;  %v373_v24 = vsub.f32 0.0, %v357_v62 }
  0xaa   : > { %3711 = vst [vmem:[#allocation23_spill] sm:$0xff] %v2422_v53  ;;  %v366_v20 = vand.u32 2147483647, %v2431_v56  ;;  %v374_v25 = vsub.f32 0.0, %v358_v63  ;;  %v383_v26 = vmul.f32 1.442695, %v2369_v14 }
  0xab   : > { %3712 = vst [vmem:[#allocation24_spill] sm:$0xff] %v2433_v57  ;;  %v375_v27 = vsub.f32 0.0, %v359_v5  ;;  %v376_v28 = vsub.f32 0.0, %v360_v6  ;;  %v377_v29 = vsub.f32 0.0, %v361_v7  ;;  %v385_v30 = vmul.f32 1.442695, %v2371_v15 }
  0xac   : > { %3713 = vst [vmem:[#allocation25_spill] sm:$0xff] %v2435_v58  ;;  %v378_v31 = vsub.f32 0.0, %v362_v10  ;;  %v379_v32 = vsub.f32 0.0, %v363_v12  ;;  %v380_v33 = vsub.f32 0.0, %v364_v17  ;;  %v387_v38 = vmul.f32 1.442695, %v2373_v16 }
  0xad   : > { %3714 = vst [vmem:[#allocation26_spill] sm:$0xff] %v2437_v59  ;;  %v381_v37 = vsub.f32 0.0, %v365_v19  ;;  %v382_v36 = vsub.f32 0.0, %v366_v20  ;;  %1693 = vpow2.f32 %v383_v26  ;;  %v391_v13 = vmul.f32 1.442695, %v371_v22 }
  0xae   : > { %3715 = vst [vmem:[#allocation27_spill] sm:$0xff] %v2439_v60  ;;  %v393_v14 = vmul.f32 1.442695, %v372_v23  ;;  %v395_v61 = vmul.f32 1.442695, %v373_v24  ;;  %1695 = vpow2.f32 %v385_v30  ;;  %v415_v17 = vmax.f32 %v2347_v1, 0.0 }
  0xaf   : > { %3716 = vst [vmem:[#allocation28_spill] sm:$0xff] %v2460_v18  ;;  %v389_v18 = vmul.f32 1.442695, %v370_v21  ;;  %v397_v62 = vmul.f32 1.442695, %v374_v25  ;;  %1697 = vpow2.f32 %v387_v38  ;;  %v416_v19 = vmax.f32 %v2350_v2, 0.0 }
  0xb0   : > { %v399_v63 = vmul.f32 1.442695, %v375_v27  ;;  %v401_v15 = vmul.f32 1.442695, %v376_v28  ;;  %v403_v5 = vmul.f32 1.442695, %v377_v29  ;;  %v435_v30 = vmul.f32 %v2399_v43, %v2362_v8 }
  0xb1   : > { %v405_v6 = vmul.f32 1.442695, %v378_v31  ;;  %v407_v7 = vmul.f32 1.442695, %v379_v32  ;;  %1699 = vpow2.f32 %v389_v18  ;;  %v409_v16 = vmul.f32 1.442695, %v380_v33 }
  0xb2   : > { %v411_v10 = vmul.f32 1.442695, %v381_v37  ;;  %v413_v12 = vmul.f32 1.442695, %v382_v36  ;;  %1701 = vpow2.f32 %v391_v13  ;;  %v417_v20 = vmax.f32 %v2353_v3, 0.0 }
  0xb3   : > { %1703 = vpow2.f32 %v393_v14  ;;  %v418_v21 = vmax.f32 %v2356_v4, 0.0  ;;  %v419_v22 = vmax.f32 %v2362_v8, 0.0  ;;  %v420_v38 = vmax.f32 %v2377_v34, 0.0  ;;  %v2479_v23 = vpop.eup %1693 }
  0xb4   : > { %1705 = vpow2.f32 %v395_v61  ;;  %v421_v37 = vmax.f32 %v2380_v35, 0.0  ;;  %v422_v36 = vmax.f32 %v2391_v40, 0.0  ;;  %v423_v1 = vmax.f32 %v2394_v41, 0.0  ;;  %v2484_v18 = vpop.eup %1695 }
  0xb5   : > { %1707 = vpow2.f32 %v397_v62  ;;  %v424_v2 = vmax.f32 %v2397_v42, 0.0  ;;  %v425_v3 = vmax.f32 %v2408_v47, 0.0  ;;  %v426_v4 = vmax.f32 %v2411_v48, 0.0  ;;  %v2489_v24 = vpop.eup %1697 }
  0xb6   : > { %1709 = vpow2.f32 %v399_v63  ;;  %v427_v25 = vmax.f32 %v2414_v49, 0.0  ;;  %v436_v31 = vmul.f32 %v2401_v44, %v2377_v34  ;;  %v437_v33 = vmul.f32 %v2403_v45, %v2380_v35 }
  0xb7   : > { %v2494_v28 = vpop.eup %1699  ;;  %1711 = vpow2.f32 %v401_v15  ;;  %v438_v13 = vmul.f32 %v2405_v46, %v2391_v40  ;;  %v439_v14 = vmul.f32 %v2416_v50, %v2394_v41  ;;  %v440_v8 = vmul.f32 %v2418_v51, %v2397_v42 }
  0xb8   : > { %v2501_v32 = vpop.eup %1701  ;;  %1713 = vpow2.f32 %v403_v5  ;;  %v441_v34 = vmul.f32 %v2420_v52, %v2408_v47  ;;  %v442_v62 = vmul.f32 %v2422_v53, %v2411_v48  ;;  %v443_v35 = vmul.f32 %v2433_v57, %v2414_v49 }
  0xb9   : > { %v2509_v61 = vpop.eup %1703  ;;  %1715 = vpow2.f32 %v405_v6  ;;  %v444_v40 = vmul.f32 %v2435_v58, %v2425_v54  ;;  %v2525_v41 = vmul.f32 %v2437_v59, %v2428_v55  ;;  %v2531_v47 = vmul.f32 %v2439_v60, %v2431_v56  ;;  %v3717_v6 = vld [vmem:[#allocation28_spill] sm:$0xff] }
  0xba   : > { %v2517_v63 = vpop.eup %1705  ;;  %1717 = vpow2.f32 %v407_v7  ;;  %v2534_v48 = vsub.f32 %v415_v17, %v2446_v0  ;;  %v463_v15 = vadd.f32 1.0, %v2479_v23  ;;  %v2540_v5 = vsub.f32 %v416_v19, %v2453_v9 }
  0xbb   : > { %v2527_v42 = vpop.eup %1707  ;;  %1719 = vpow2.f32 %v409_v16  ;;  %v2543_v7 = vsub.f32 %v417_v20, %v3717_v6  ;;  %v472_v16 = vadd.f32 1.0, %v2484_v18  ;;  %v2549_v27 = vsub.f32 %v418_v21, %v2471_v11 }
  0xbc   : > { %v2537_v49 = vpop.eup %1709  ;;  %1721 = vpow2.f32 %v411_v10  ;;  %v2551_v0 = vsub.f32 %v419_v22, %v435_v30  ;;  %v481_v17 = vadd.f32 1.0, %v2489_v24  ;;  %v2556_v10 = vsub.f32 %v420_v38, %v436_v31 }
  0xbd   : > { %v2546_v29 = vpop.eup %1711  ;;  %1723 = vpow2.f32 %v413_v12  ;;  %v2558_v9 = vsub.f32 %v421_v37, %v437_v33  ;;  %v2560_v19 = vsub.f32 %v422_v36, %v438_v13  ;;  %v466_v20 = vmul.f32 -0.5, %v2479_v23 }
  0xbe   : > { %v2554_v26 = vpop.eup %1713  ;;  %v2565_v12 = vsub.f32 %v423_v1, %v439_v14  ;;  %1725 = vlog2.f32 %v463_v15  ;;  %v475_v11 = vmul.f32 -0.5, %v2484_v18  ;;  %v490_v21 = vadd.f32 1.0, %v2494_v28 }
  0xbf   : > { %v2563_v6 = vpop.eup %1715  ;;  %v2571_v30 = vsub.f32 %v424_v2, %v440_v8  ;;  %v469_v38 = vand.u32 2147483647, %v2479_v23  ;;  %1727 = vlog2.f32 %v472_v16  ;;  %v484_v37 = vmul.f32 -0.5, %v2489_v24 }
  0xc0   : > { %v2569_v22 = vpop.eup %1717  ;;  %v2577_v31 = vsub.f32 %v425_v3, %v441_v34  ;;  %v2579_v1 = vsub.f32 %v426_v4, %v442_v62  ;;  %v478_v33 = vand.u32 2147483647, %v2484_v18  ;;  %1729 = vlog2.f32 %v481_v17 }
  0xc1   : > { %v2575_v36 = vpop.eup %1719  ;;  %v2584_v14 = vsub.f32 %v427_v25, %v443_v35  ;;  %v467_v2 = vadd.f32 1.0, %v466_v20  ;;  %v487_v8 = vand.u32 2147483647, %v2489_v24  ;;  %v499_v15 = vadd.f32 1.0, %v2501_v32 }
  0xc2   : > { %v2582_v13 = vpop.eup %1721  ;;  %v476_v60 = vadd.f32 1.0, %v475_v11  ;;  %1731 = vlog2.f32 %v490_v21  ;;  %v493_v3 = vmul.f32 -0.5, %v2494_v28  ;;  %v508_v4 = vadd.f32 1.0, %v2509_v61 }
  0xc3   : > { %v2588_v16 = vpop.eup %1723  ;;  %vm2592_vm0 = vcmp.lt.f32.partialorder %v469_v38, 0.0004427343  ;;  %v485_v62 = vadd.f32 1.0, %v484_v37  ;;  %v496_v25 = vand.u32 2147483647, %v2494_v28  ;;  %v502_v35 = vmul.f32 -0.5, %v2501_v32 }
  0xc4   : > { %v1726_v17 = vpop.eup %1725  ;;  %v3720_v20 = vmax.f32 %v2425_v54, 0.0  ;;  %vm2602_vm1 = vcmp.lt.f32.partialorder %v478_v33, 0.0004427343  ;;  %v505_v21 = vand.u32 2147483647, %v2501_v32  ;;  %v517_v38 = vadd.f32 1.0, %v2517_v63 }
  0xc5   : > { %v1728_v58 = vpop.eup %1727  ;;  %v2609_v37 = vmul.f32 %v2479_v23, %v467_v2  ;;  %vm2611_vm2 = vcmp.lt.f32.partialorder %v487_v8, 0.0004427343  ;;  %1733 = vlog2.f32 %v499_v15  ;;  %v511_v54 = vmul.f32 -0.5, %v2509_v61 }
  0xc6   : > { %v2600_v59 = vsub.f32 %v3720_v20, %v444_v40  ;;  %v1730_v40 = vpop.eup %1729  ;;  %v2617_v33 = vmul.f32 %v2484_v18, %v476_v60  ;;  %v494_v20 = vadd.f32 1.0, %v493_v3  ;;  %1735 = vlog2.f32 %v508_v4 }
  0xc7   : > { %v526_v53 = vadd.f32 1.0, %v2527_v42  ;;  %v2621_v52 = vmul.f32 %v2489_v24, %v485_v62  ;;  %vm2623_vm3 = vcmp.lt.f32.partialorder %v496_v25, 0.0004427343  ;;  %v503_v2 = vadd.f32 1.0, %v502_v35 }
  0xc8   : > { %v514_v8 = vand.u32 2147483647, %v2509_v61  ;;  %v1732_v15 = vpop.eup %1731  ;;  %v2628_v51 = vmul.f32 0.6931472, %v1726_v17  ;;  %vm2630_vm4 = vcmp.lt.f32.partialorder %v505_v21, 0.0004427343  ;;  %1737 = vlog2.f32 %v517_v38 }
  0xc9   : > { %v535_v18 = vadd.f32 1.0, %v2537_v49  ;;  %v2635_v3 = vmul.f32 0.6931472, %v1728_v58  ;;  %v2637_v24 = vmul.f32 0.6931472, %v1730_v40  ;;  %v512_v4 = vadd.f32 1.0, %v511_v54 }
  0xca   : > { %v520_v62 = vmul.f32 -0.5, %v2517_v63  ;;  %v2641_v25 = vmul.f32 %v2494_v28, %v494_v20  ;;  %v523_v35 = vand.u32 2147483647, %v2517_v63  ;;  %1739 = vlog2.f32 %v526_v53 }
  0xcb   : > { %v529_v17 = vmul.f32 -0.5, %v2527_v42  ;;  %v1734_v21 = vpop.eup %1733  ;;  %v2645_v50 = vmul.f32 0.6931472, %v1732_v15  ;;  %v2648_v38 = vmul.f32 %v2501_v32, %v503_v2  ;;  %vm2650_vm5 = vcmp.lt.f32.partialorder %v514_v8, 0.0004427343 }
  0xcc   : > { %v532_v54 = vand.u32 2147483647, %v2527_v42  ;;  %v1736_v40 = vpop.eup %1735  ;;  %v471_v53 = vsel %vm2592_vm0, %v2609_v37, %v2628_v51  ;;  %1741 = vlog2.f32 %v535_v18  ;;  %v538_v28 = vmul.f32 -0.5, %v2537_v49 }
  0xcd   : > { %v544_v20 = vadd.f32 1.0, %v2546_v29  ;;  %v480_v32 = vsel %vm2602_vm1, %v2617_v33, %v2635_v3  ;;  %v2670_v8 = vmul.f32 %v2509_v61, %v512_v4  ;;  %v521_v34 = vadd.f32 1.0, %v520_v62 }
  0xce   : > { %v1738_v51 = vpop.eup %1737  ;;  %v2672_v37 = vmul.f32 0.6931472, %v1734_v21  ;;  %vm2674_vm6 = vcmp.lt.f32.partialorder %v523_v35, 0.0004427343  ;;  %v530_v18 = vadd.f32 1.0, %v529_v17  ;;  %v547_v11 = vmul.f32 -0.5, %v2546_v29 }
  0xcf   : > { %v498_v33 = vsel %vm2623_vm3, %v2641_v25, %v2645_v50  ;;  %v2683_v3 = vmul.f32 0.6931472, %v1736_v40  ;;  %vm2685_vm7 = vcmp.lt.f32.partialorder %v532_v54, 0.0004427343  ;;  %v541_v4 = vand.u32 2147483647, %v2537_v49 }
  0xd0   : > { %v1740_v62 = vpop.eup %1739  ;;  %v539_v35 = vadd.f32 1.0, %v538_v28  ;;  %1743 = vlog2.f32 %v544_v20  ;;  %v553_v17 = vadd.f32 1.0, %v2554_v26  ;;  %v556_v21 = vmul.f32 -0.5, %v2554_v26 }
  0xd1   : > { %v2692_v2 = vmul.f32 0.6931472, %v1738_v51  ;;  %v2695_v23 = vmul.f32 %v2517_v63, %v521_v34  ;;  %v550_v50 = vand.u32 2147483647, %v2546_v29  ;;  %v562_v25 = vadd.f32 1.0, %v2563_v6 }
  0xd2   : > { %v1742_v54 = vpop.eup %1741  ;;  %v507_v40 = vsel %vm2630_vm4, %v2648_v38, %v2672_v37  ;;  %v2704_v28 = vmul.f32 %v2527_v42, %v530_v18  ;;  %v548_v20 = vadd.f32 1.0, %v547_v11  ;;  %v565_v51 = vmul.f32 -0.5, %v2563_v6 }
  0xd3   : > { %v516_v63 = vsel %vm2650_vm5, %v2670_v8, %v2683_v3  ;;  %v2711_v34 = vmul.f32 0.6931472, %v1740_v62  ;;  %vm2713_vm8 = vcmp.lt.f32.partialorder %v541_v4, 0.0004427343  ;;  %v559_v60 = vand.u32 2147483647, %v2554_v26 }
  0xd4   : > { %v2719_v38 = vmul.f32 %v2537_v49, %v539_v35  ;;  %1745 = vlog2.f32 %v553_v17  ;;  %v557_v42 = vadd.f32 1.0, %v556_v21  ;;  %v571_v37 = vadd.f32 1.0, %v2569_v22 }
  0xd5   : > { %v525_v58 = vsel %vm2674_vm6, %v2695_v23, %v2692_v2  ;;  %v2726_v8 = vmul.f32 0.6931472, %v1742_v54  ;;  %vm2728_vm9 = vcmp.lt.f32.partialorder %v550_v50, 0.0004427343  ;;  %1747 = vlog2.f32 %v562_v25 }
  0xd6   : > { %v1744_v11 = vpop.eup %1743  ;;  %v2733_v49 = vmul.f32 %v2546_v29, %v548_v20  ;;  %v566_v3 = vadd.f32 1.0, %v565_v51  ;;  %v568_v4 = vand.u32 2147483647, %v2563_v6  ;;  %v580_v62 = vadd.f32 1.0, %v2575_v36 }
  0xd7   : > { %v534_v35 = vsel %vm2685_vm7, %v2704_v28, %v2711_v34  ;;  %vm2741_vm10 = vcmp.lt.f32.partialorder %v559_v60, 0.0004427343  ;;  %v574_v21 = vmul.f32 -0.5, %v2569_v22  ;;  %v577_v50 = vand.u32 2147483647, %v2569_v22 }
  0xd8   : > { %v2748_v29 = vmul.f32 %v2554_v26, %v557_v42  ;;  %1749 = vlog2.f32 %v571_v37  ;;  %v589_v25 = vadd.f32 1.0, %v2582_v13  ;;  %v2752_v54 = vadd.f32 %v471_v53, %v2534_v48 }
  0xd9   : > { %v543_v61 = vsel %vm2713_vm8, %v2719_v38, %v2726_v8  ;;  %v2758_v28 = vmul.f32 0.6931472, %v1744_v11  ;;  %v598_v20 = vadd.f32 1.0, %v2588_v16  ;;  %v2762_v51 = vadd.f32 %v480_v32, %v2540_v5 }
  0xda   : > { %v1746_v26 = vpop.eup %1745  ;;  %v2765_v34 = vmul.f32 %v2563_v6, %v566_v3  ;;  %vm2767_vm11 = vcmp.lt.f32.partialorder %v568_v4, 0.0004427343  ;;  %1751 = vlog2.f32 %v580_v62  ;;  %v583_v48 = vmul.f32 -0.5, %v2575_v36 }
  0xdb   : > { %v1748_v46 = vpop.eup %1747  ;;  %v575_v53 = vadd.f32 1.0, %v574_v21  ;;  %vm2772_vm12 = vcmp.lt.f32.partialorder %v577_v50, 0.0004427343  ;;  %v586_v5 = vand.u32 2147483647, %v2575_v36  ;;  %v3745_v6 = vsel %vm2611_vm2, %v2621_v52, %v2637_v24 }
  0xdc   : > { %v2783_v32 = vadd.f32 %v3745_v6, %v2543_v7  ;;  %1753 = vlog2.f32 %v589_v25  ;;  %v592_v42 = vmul.f32 -0.5, %v2582_v13  ;;  %v2787_v37 = vadd.f32 %v498_v33, %v2549_v27 }
  0xdd   : > { %v623_v8 = vsub.f32 0.0, %v2752_v54  ;;  %v552_v11 = vsel %vm2728_vm9, %v2733_v49, %v2758_v28  ;;  %v555_v3 = vmul.f32 0.6931472, %v1746_v26  ;;  %1755 = vlog2.f32 %v598_v20 }
  0xde   : > { %v624_v57 = vsub.f32 0.0, %v2762_v51  ;;  %v1750_v52 = vpop.eup %1749  ;;  %v564_v7 = vmul.f32 0.6931472, %v1748_v46  ;;  %v584_v24 = vadd.f32 1.0, %v583_v48  ;;  %v595_v4 = vand.u32 2147483647, %v2582_v13 }
  0xdf   : > { %v601_v62 = vmul.f32 -0.5, %v2588_v16  ;;  %v576_v27 = vmul.f32 %v2569_v22, %v575_v53  ;;  %vm2798_vm13 = vcmp.lt.f32.partialorder %v586_v5, 0.0004427343  ;;  %v2803_v18 = vadd.f32 %v507_v40, %v2551_v0 }
  0xe0   : > { %v625_v49 = vsub.f32 0.0, %v2783_v32  ;;  %v1752_v21 = vpop.eup %1751  ;;  %v593_v50 = vadd.f32 1.0, %v592_v42  ;;  %v2807_v25 = vadd.f32 %v516_v63, %v2556_v10  ;;  %v626_v28 = vsub.f32 0.0, %v2787_v37 }
  0xe1   : > { %v639_v20 = vmul.f32 1.442695, %v623_v8  ;;  %v561_v22 = vsel %vm2741_vm10, %v2748_v29, %v555_v3  ;;  %v573_v26 = vmul.f32 0.6931472, %v1750_v52  ;;  %v604_v48 = vand.u32 2147483647, %v2588_v16 }
  0xe2   : > { %v641_v46 = vmul.f32 1.442695, %v624_v57  ;;  %v1754_v0 = vpop.eup %1753  ;;  %v570_v40 = vsel %vm2767_vm11, %v2765_v34, %v564_v7  ;;  %v585_v53 = vmul.f32 %v2575_v36, %v584_v24  ;;  %vm2818_vm14 = vcmp.lt.f32.partialorder %v595_v4, 0.0004427343 }
  0xe3   : > { %v602_v63 = vadd.f32 1.0, %v601_v62  ;;  %v1756_v5 = vpop.eup %1755  ;;  %v582_v6 = vmul.f32 0.6931472, %v1752_v21  ;;  %v2828_v17 = vadd.f32 %v525_v58, %v2558_v9  ;;  %v627_v29 = vsub.f32 0.0, %v2803_v18 }
  0xe4   : > { %v643_v34 = vmul.f32 1.442695, %v625_v49  ;;  %v2832_v36 = vadd.f32 %v534_v35, %v2560_v19  ;;  %v628_v60 = vsub.f32 0.0, %v2807_v25  ;;  %1757 = vpow2.f32 %v639_v20 }
  0xe5   : > { %v645_v42 = vmul.f32 1.442695, %v626_v28  ;;  %v579_v8 = vsel %vm2772_vm12, %v576_v27, %v573_v26  ;;  %v594_v15 = vmul.f32 %v2582_v13, %v593_v50  ;;  %vm2838_vm15 = vcmp.lt.f32.partialorder %v604_v48, 0.0004427343  ;;  %v3755_v48 = vld [vmem:[#allocation17_spill] sm:$0xff] }
  0xe6   : > { %1759 = vpow2.f32 %v641_v46  ;;  %v591_v9 = vmul.f32 0.6931472, %v1754_v0  ;;  %v600_v2 = vmul.f32 0.6931472, %v1756_v5  ;;  %v603_v23 = vmul.f32 %v2588_v16, %v602_v63  ;;  %v3756_v5 = vld [vmem:[#allocation18_spill] sm:$0xff] }
  0xe7   : > { %v2844_v19 = vadd.f32 %v543_v61, %v2565_v12  ;;  %v588_v58 = vsel %vm2798_vm13, %v585_v53, %v582_v6  ;;  %v629_v35 = vsub.f32 0.0, %v2828_v17  ;;  %1761 = vpow2.f32 %v643_v34 }
  0xe8   : > { %v647_v38 = vmul.f32 1.442695, %v627_v29  ;;  %v2850_v13 = vadd.f32 %v552_v11, %v2571_v30  ;;  %v630_v57 = vsub.f32 0.0, %v2832_v36  ;;  %1763 = vpow2.f32 %v645_v42 }
  0xe9   : > { %v649_v52 = vmul.f32 1.442695, %v628_v60  ;;  %v3752_v16 = vmax.f32 %v2428_v55, 0.0  ;;  %v3753_v12 = vmax.f32 %v2431_v56, 0.0  ;;  %v2860_v24 = vadd.f32 %v561_v22, %v2577_v31  ;;  %v3754_v22 = vld [vmem:[#allocation16_spill] sm:$0xff] }
  0xea   : > { %v2863_v4 = vadd.f32 %v570_v40, %v2579_v1  ;;  %v1758_v30 = vpop.eup %1757  ;;  %v597_v11 = vsel %vm2818_vm14, %v594_v15, %v591_v9  ;;  %v606_v62 = vsel %vm2838_vm15, %v603_v23, %v600_v2  ;;  %v2870_v55 = vadd.f32 %v579_v8, %v2584_v14 }
  0xeb   : > { %v461_v7 = vsub.f32 %v3752_v16, %v2525_v41  ;;  %v462_v61 = vsub.f32 %v3753_v12, %v2531_v47  ;;  %v2873_v56 = vadd.f32 %v588_v58, %v2600_v59  ;;  %v631_v47 = vsub.f32 0.0, %v2844_v19 }
  0xec   : > { %v1760_v41 = vpop.eup %1759  ;;  %1765 = vpow2.f32 %v647_v38  ;;  %v651_v31 = vmul.f32 1.442695, %v629_v35  ;;  %v632_v1 = vsub.f32 0.0, %v2850_v13  ;;  %v653_v27 = vmul.f32 1.442695, %v630_v57 }
  0xed   : > { %1767 = vpow2.f32 %v649_v52  ;;  %v1762_v33 = vpop.eup %1761  ;;  %v2877_v49 = vadd.f32 %v597_v11, %v461_v7  ;;  %v2879_v21 = vadd.f32 %v606_v62, %v462_v61  ;;  %v633_v14 = vsub.f32 0.0, %v2860_v24 }
  0xee   : > { %v634_v50 = vsub.f32 0.0, %v2863_v4  ;;  %v1764_v28 = vpop.eup %1763  ;;  %v671_v59 = vsub.f32 1.0, %v1758_v30  ;;  %v672_v20 = vsub.f32 1.0, %v1760_v41  ;;  %v687_v26 = vmul.f32 0.5, %v3754_v22 }
  0xef   : > { %v688_v46 = vmul.f32 0.5, %v3755_v48  ;;  %v635_v0 = vsub.f32 0.0, %v2870_v55  ;;  %v636_v40 = vsub.f32 0.0, %v2873_v56  ;;  %1769 = vpow2.f32 %v651_v31 }
  0xf0   : > { %v655_v53 = vmul.f32 1.442695, %v631_v47  ;;  %1771 = vpow2.f32 %v653_v27  ;;  %v657_v10 = vmul.f32 1.442695, %v632_v1  ;;  %v673_v63 = vsub.f32 1.0, %v1762_v33 }
  0xf1   : > { %v689_v6 = vmul.f32 0.5, %v3756_v5  ;;  %v637_v34 = vsub.f32 0.0, %v2877_v49  ;;  %v659_v60 = vmul.f32 1.442695, %v633_v14  ;;  %v674_v42 = vsub.f32 1.0, %v1764_v28 }
  0xf2   : > { %v1766_v29 = vpop.eup %1765  ;;  %v690_v8 = vmul.f32 0.5, %v2388_v39  ;;  %v703_v3 = vadd.f32 0.25, %v687_v26  ;;  %v704_v9 = vadd.f32 0.25, %v688_v46  ;;  %v719_v2 = vmul.f32 %v671_v59, %v671_v59 }
  0xf3   : > { %v1768_v15 = vpop.eup %1767  ;;  %v720_v23 = vmul.f32 %v672_v20, %v672_v20  ;;  %v638_v58 = vsub.f32 0.0, %v2879_v21  ;;  %1773 = vpow2.f32 %v655_v53  ;;  %v661_v35 = vmul.f32 1.442695, %v634_v50  ;;  %v3757_v20 = vld [vmem:[#allocation19_spill] sm:$0xff] }
  0xf4   : > { %v691_v38 = vmul.f32 0.5, %v2399_v43  ;;  %1775 = vpow2.f32 %v657_v10  ;;  %v675_v57 = vsub.f32 1.0, %v1766_v29  ;;  %v705_v52 = vadd.f32 0.25, %v689_v6  ;;  %v3758_v10 = vld [vmem:[#allocation20_spill] sm:$0xff] }
  0xf5   : > { %v721_v16 = vmul.f32 %v673_v63, %v673_v63  ;;  %v1770_v7 = vpop.eup %1769  ;;  %1777 = vpow2.f32 %v659_v60  ;;  %v663_v12 = vmul.f32 1.442695, %v635_v0  ;;  %v676_v61 = vsub.f32 1.0, %v1768_v15  ;;  %v3759_v15 = vld [vmem:[#allocation21_spill] sm:$0xff] }
  0xf6   : > { %v692_v39 = vmul.f32 0.5, %v2401_v44  ;;  %v1772_v30 = vpop.eup %1771  ;;  %v706_v11 = vadd.f32 0.25, %v690_v8  ;;  %v722_v62 = vmul.f32 %v674_v42, %v674_v42  ;;  %v735_v41 = vmul.f32 %v719_v2, %v703_v3 }
  0xf7   : > { %v736_v47 = vmul.f32 %v720_v23, %v704_v9  ;;  %1779 = vpow2.f32 %v661_v35  ;;  %v665_v31 = vmul.f32 1.442695, %v636_v40  ;;  %v667_v1 = vmul.f32 1.442695, %v637_v34 }
  0xf8   : > { %v693_v43 = vmul.f32 0.5, %v2403_v45  ;;  %v677_v27 = vsub.f32 1.0, %v1770_v7  ;;  %v707_v33 = vadd.f32 0.25, %v691_v38  ;;  %v723_v14 = vmul.f32 %v675_v57, %v675_v57  ;;  %v3760_v38 = vld [vmem:[#allocation22_spill] sm:$0xff] }
  0xf9   : > { %v737_v50 = vmul.f32 %v721_v16, %v705_v52  ;;  %v1774_v28 = vpop.eup %1773  ;;  %1781 = vpow2.f32 %v663_v12  ;;  %v678_v59 = vsub.f32 1.0, %v1772_v30  ;;  %v694_v22 = vmul.f32 0.5, %v3757_v20  ;;  %v3761_v30 = vld [vmem:[#allocation23_spill] sm:$0xff] }
  0xfa   : > { %v708_v44 = vadd.f32 0.25, %v692_v39  ;;  %v1776_v26 = vpop.eup %1775  ;;  %v724_v48 = vmul.f32 %v676_v61, %v676_v61  ;;  %v738_v46 = vmul.f32 %v722_v62, %v706_v11  ;;  %v751_v0 = vmul.f32 %v735_v41, %v2752_v54 }
  0xfb   : > { %v752_v40 = vmul.f32 %v736_v47, %v2762_v51  ;;  %v1778_v53 = vpop.eup %1777  ;;  %1783 = vpow2.f32 %v665_v31  ;;  %v669_v45 = vmul.f32 1.442695, %v638_v58  ;;  %v695_v63 = vmul.f32 0.5, %v3758_v10 }
  0xfc   : > { %v709_v5 = vadd.f32 0.25, %v693_v43  ;;  %v679_v6 = vsub.f32 1.0, %v1774_v28  ;;  %v725_v29 = vmul.f32 %v677_v27, %v677_v27  ;;  %v739_v34 = vmul.f32 %v723_v14, %v707_v33  ;;  %v3762_v27 = vld [vmem:[#allocation24_spill] sm:$0xff] }
  0xfd   : > { %v753_v60 = vmul.f32 %v737_v50, %v2783_v32  ;;  %v1780_v42 = vpop.eup %1779  ;;  %1785 = vpow2.f32 %v667_v1  ;;  %v680_v8 = vsub.f32 1.0, %v1776_v26  ;;  %v696_v3 = vmul.f32 0.5, %v3759_v15 }
  0xfe   : > { %v710_v9 = vadd.f32 0.25, %v694_v22  ;;  %v726_v54 = vmul.f32 %v678_v59, %v678_v59  ;;  %v740_v2 = vmul.f32 %v724_v48, %v708_v44  ;;  %v754_v51 = vmul.f32 %v738_v46, %v2787_v37  ;;  %v3763_v44 = vld [vmem:[#allocation25_spill] sm:$0xff] }
  0xff   : > { %v768_v23 = vadd.f32 %v752_v40, %v751_v0  ;;  %v1782_v58 = vpop.eup %1781  ;;  %1787 = vpow2.f32 %v669_v45  ;;  %v681_v35 = vsub.f32 1.0, %v1778_v53  ;;  %v697_v57 = vmul.f32 0.5, %v3760_v38  ;;  %v3764_v45 = vld [vmem:[#allocation26_spill] sm:$0xff] }
 0x100   : > { %v711_v52 = vadd.f32 0.25, %v695_v63  ;;  %v727_v16 = vmul.f32 %v679_v6, %v679_v6  ;;  %v741_v7 = vmul.f32 %v725_v29, %v709_v5  ;;  %v755_v32 = vmul.f32 %v739_v34, %v2803_v18 }
 0x101   : > { %v769_v12 = vadd.f32 %v768_v23, %v753_v60  ;;  %v1784_v61 = vpop.eup %1783  ;;  %v682_v39 = vsub.f32 1.0, %v1780_v42  ;;  %v698_v11 = vmul.f32 0.5, %v3761_v30  ;;  %v712_v62 = vadd.f32 0.25, %v696_v3  ;;  %v3765_v60 = vld [vmem:[#allocation27_spill] sm:$0xff] }
 0x102   : > { %v728_v41 = vmul.f32 %v680_v8, %v680_v8  ;;  %v742_v47 = vmul.f32 %v726_v54, %v710_v9  ;;  %v756_v37 = vmul.f32 %v740_v2, %v2807_v25  ;;  %v683_v43 = vsub.f32 1.0, %v1782_v58 }
 0x103   : > { %v770_v31 = vadd.f32 %v769_v12, %v754_v51  ;;  %v1786_v1 = vpop.eup %1785  ;;  %v699_v33 = vmul.f32 0.5, %v3762_v27  ;;  %v713_v14 = vadd.f32 0.25, %v697_v57  ;;  %v729_v50 = vmul.f32 %v681_v35, %v681_v35 }
 0x104   : > { %v743_v28 = vmul.f32 %v727_v16, %v711_v52  ;;  %v757_v18 = vmul.f32 %v741_v7, %v2828_v17  ;;  %v684_v22 = vsub.f32 1.0, %v1784_v61  ;;  %v700_v26 = vmul.f32 0.5, %v3763_v44 }
 0x105   : > { %v771_v59 = vadd.f32 %v770_v31, %v755_v32  ;;  %v1788_v20 = vpop.eup %1787  ;;  %v714_v48 = vadd.f32 0.25, %v698_v11  ;;  %v730_v46 = vmul.f32 %v682_v39, %v682_v39  ;;  %v744_v0 = vmul.f32 %v728_v41, %v712_v62  ;;  %v767_v41 = vld [vmem:[%s2332_s24] sm:$0xff] }
 0x106   : > { %v758_v25 = vmul.f32 %v742_v47, %v2832_v36  ;;  %v685_v53 = vsub.f32 1.0, %v1786_v1  ;;  %v701_v10 = vmul.f32 0.5, %v3764_v45  ;;  %v715_v63 = vadd.f32 0.25, %v699_v33 }
 0x107   : > { %v772_v40 = vadd.f32 %v771_v59, %v756_v37  ;;  %v731_v5 = vmul.f32 %v683_v43, %v683_v43  ;;  %v745_v6 = vmul.f32 %v729_v50, %v713_v14  ;;  %v759_v29 = vmul.f32 %v743_v28, %v2844_v19 }
 0x108   : > { %v686_v34 = vsub.f32 1.0, %v1788_v20  ;;  %v702_v42 = vmul.f32 0.5, %v3765_v60  ;;  %v716_v8 = vadd.f32 0.25, %v700_v26  ;;  %v732_v15 = vmul.f32 %v684_v22, %v684_v22 }
 0x109   : > { %v773_v17 = vadd.f32 %v772_v40, %v757_v18  ;;  %v746_v3 = vmul.f32 %v730_v46, %v714_v48  ;;  %v760_v9 = vmul.f32 %v744_v0, %v2850_v13  ;;  %v717_v36 = vadd.f32 0.25, %v701_v10 }
 0x10a   : > { %v733_v2 = vmul.f32 %v685_v53, %v685_v53  ;;  %v747_v51 = vmul.f32 %v731_v5, %v715_v63  ;;  %v761_v23 = vmul.f32 %v745_v6, %v2860_v24  ;;  %v718_v35 = vadd.f32 0.25, %v702_v42 }
 0x10b   : > { %v774_v54 = vadd.f32 %v773_v17, %v758_v25  ;;  %v734_v38 = vmul.f32 %v686_v34, %v686_v34  ;;  %v748_v19 = vmul.f32 %v732_v15, %v716_v8  ;;  %v762_v57 = vmul.f32 %v746_v3, %v2863_v4 }
 0x10c   : > { %v749_v16 = vmul.f32 %v733_v2, %v717_v36  ;;  %v763_v7 = vmul.f32 %v747_v51, %v2870_v55 }
 0x10d   : > { %v775_v58 = vadd.f32 %v774_v54, %v759_v29  ;;  %v750_v13 = vmul.f32 %v734_v38, %v718_v35  ;;  %v764_v12 = vmul.f32 %v748_v19, %v2873_v56 }
 0x10e   : > { %v765_v39 = vmul.f32 %v749_v16, %v2877_v49 }
 0x10f   : > { %v776_v52 = vadd.f32 %v775_v58, %v760_v9  ;;  %v766_v30 = vmul.f32 %v750_v13, %v2879_v21 }
 0x111   : > { %v777_v32 = vadd.f32 %v776_v52, %v761_v23 }
 0x113   : > { %v778_v61 = vadd.f32 %v777_v32, %v762_v57 }
 0x115   : > { %v779_v24 = vadd.f32 %v778_v61, %v763_v7 }
 0x117   : > { %v780_v11 = vadd.f32 %v779_v24, %v764_v12 }
 0x119   : > { %v781_v62 = vadd.f32 %v780_v11, %v765_v39 }
 0x11b   : > { %v782_v47 = vadd.f32 %v781_v62, %v766_v30 }
 0x11d   : > { %v783_v4 = vadd.f32 %v782_v47, %v767_v41 }
 0x11f   : > { %784 = vst [vmem:[%s2332_s24] sm:$0xff] %v783_v4 }
 0x120 PF: > { %p1506_p13 = scmp.le.s32.totalorder %s2343_s26, 781 }
 0x122   : > { %788 = sbr.rel (%p1506_p13) target bundleno = 442 (0x1ba), region = 48 }
 0x127   : > { %v2923_v55 = vld [vmem:[%s2317_s29] sm:$0xff]  ;;  %v2926_v56 = vld [vmem:[%s2317_s29 + $0x8] sm:$0xff]  ;;  %v2929_v49 = vld [vmem:[%s2317_s29 + $0x10] sm:$0xff] }
 0x128   : > { %v853_v21 = vand.u32 2147483647, %v2923_v55  ;;  %v854_v37 = vand.u32 2147483647, %v2926_v56  ;;  %v2934_v31 = vld [vmem:[%s2317_s29 + $0x18] sm:$0xff]  ;;  %v2938_v43 = vld [vmem:[%s2317_s29 + $0x20] sm:$0xff] }
 0x129   : > { %v855_v1 = vand.u32 2147483647, %v2929_v49  ;;  %v1546_v27 = vld [vmem:[%s2323_s27] sm:$0xff]   ;;  %v1585_v33 = vld [vmem:[%s2323_s27 + $0x8] sm:$0xff]   ;;  %v1587_v14 = vld [vmem:[%s2323_s27 + $0x10] sm:$0xff]  }
 0x12a   : > { %v856_v50 = vand.u32 2147483647, %v2934_v31  ;;  %v2944_v28 = vsub.f32 0.0, %v853_v21  ;;  %v2946_v18 = vsub.f32 0.0, %v854_v37  ;;  %v1547_v59 = vunpack.c.0.s8 %v1546_v27  ;;  %v1589_v22 = vld [vmem:[%s2323_s27 + $0x18] sm:$0xff]   ;;  %v2957_v8 = vld [vmem:[%s2317_s29 + $0x28] sm:$0xff] }
 0x12b   : > { %v1548_v20 = vunpack.c.1.s8 %v1546_v27  ;;  %v857_v44 = vand.u32 2147483647, %v2938_v43  ;;  %v2950_v26 = vsub.f32 0.0, %v855_v1  ;;  %v1551_v48 = vunpack.c.2.s8 %v1546_v27  ;;  %v2960_v15 = vld [vmem:[%s2317_s29 + $0x30] sm:$0xff]  ;;  %v2963_v3 = vld [vmem:[%s2317_s29 + $0x38] sm:$0xff]  ;;  %v2974_v51 = vld [vmem:[%s2317_s29 + $0x40] sm:$0xff] }
 0x12c   : > { %v1552_v46 = vunpack.c.3.s8 %v1546_v27  ;;  %v1555_v0 = vunpack.c.0.s8 %v1585_v33  ;;  %v1556_v25 = vunpack.c.1.s8 %v1585_v33  ;;  %v1559_v40 = vunpack.c.2.s8 %v1585_v33  ;;  %v2977_v23 = vld [vmem:[%s2317_s29 + $0x48] sm:$0xff]  ;;  %v2980_v58 = vld [vmem:[%s2317_s29 + $0x50] sm:$0xff]  ;;  %v2991_v52 = vld [vmem:[%s2317_s29 + $0x58] sm:$0xff] }
 0x12d   : > { %v1560_v53 = vunpack.c.3.s8 %v1585_v33  ;;  %v1563_v45 = vunpack.c.0.s8 %v1587_v14  ;;  %v1564_v10 = vunpack.c.1.s8 %v1587_v14  ;;  %v1567_v63 = vunpack.c.2.s8 %v1587_v14  ;;  %v2994_v16 = vld [vmem:[%s2317_s29 + $0x60] sm:$0xff]  ;;  %v2997_v7 = vld [vmem:[%s2317_s29 + $0x68] sm:$0xff]  ;;  %v3008_v39 = vld [vmem:[%s2317_s29 + $0x70] sm:$0xff] }
 0x12e   : > { %v1568_v5 = vunpack.c.3.s8 %v1587_v14  ;;  %v1571_v6 = vunpack.c.0.s8 %v1589_v22  ;;  %v1572_v29 = vunpack.c.1.s8 %v1589_v22  ;;  %v1575_v17 = vunpack.c.2.s8 %v1589_v22  ;;  %v3011_v24 = vld [vmem:[%s2317_s29 + $0x78] sm:$0xff] }
 0x12f   : > { %v1576_v34 = vunpack.c.3.s8 %v1589_v22  ;;  %v2952_v60 = vcvt.s32.f32 %v1547_v59  ;;  %v2954_v42 = vcvt.s32.f32 %v1548_v20  ;;  %v2965_v9 = vcvt.s32.f32 %v1551_v48 }
 0x130   : > { %v2967_v54 = vcvt.s32.f32 %v1552_v46  ;;  %v2969_v36 = vcvt.s32.f32 %v1555_v0  ;;  %v2971_v2 = vcvt.s32.f32 %v1556_v25  ;;  %v2982_v35 = vcvt.s32.f32 %v1559_v40 }
 0x131   : > { %3766 = vst [vmem:[#allocation29_spill] sm:$0xff] %v2952_v60  ;;  %v2984_v38 = vcvt.s32.f32 %v1560_v53  ;;  %v2986_v19 = vcvt.s32.f32 %v1563_v45  ;;  %v2988_v57 = vcvt.s32.f32 %v1564_v10  ;;  %v2999_v32 = vcvt.s32.f32 %v1567_v63 }
 0x132   : > { %3767 = vst [vmem:[#allocation30_spill] sm:$0xff] %v2954_v42  ;;  %v3001_v13 = vcvt.s32.f32 %v1568_v5  ;;  %v3003_v12 = vcvt.s32.f32 %v1571_v6  ;;  %v3005_v61 = vcvt.s32.f32 %v1572_v29  ;;  %v3013_v30 = vcvt.s32.f32 %v1575_v17 }
 0x133   : > { %3768 = vst [vmem:[#allocation31_spill] sm:$0xff] %v2965_v9  ;;  %v3015_v11 = vcvt.s32.f32 %v1576_v34  ;;  %v858_v62 = vand.u32 2147483647, %v2957_v8  ;;  %v859_v41 = vand.u32 2147483647, %v2960_v15  ;;  %v3024_v37 = vmul.f32 %v2952_v60, %v2923_v55 }
 0x134   : > { %3769 = vst [vmem:[#allocation32_spill] sm:$0xff] %v2967_v54  ;;  %v860_v47 = vand.u32 2147483647, %v2963_v3  ;;  %v861_v4 = vand.u32 2147483647, %v2974_v51  ;;  %v3031_v14 = vmul.f32 %v2954_v42, %v2926_v56  ;;  %v872_v22 = vsub.f32 0.0, %v856_v50 }
 0x135   : > { %3770 = vst [vmem:[#allocation33_spill] sm:$0xff] %v2969_v36  ;;  %v862_v21 = vand.u32 2147483647, %v2977_v23  ;;  %v863_v1 = vand.u32 2147483647, %v2980_v58  ;;  %v3037_v48 = vmul.f32 %v2965_v9, %v2929_v49  ;;  %v873_v0 = vsub.f32 0.0, %v857_v44 }
 0x136   : > { %3771 = vst [vmem:[#allocation34_spill] sm:$0xff] %v2971_v2  ;;  %v864_v27 = vand.u32 2147483647, %v2991_v52  ;;  %v865_v33 = vand.u32 2147483647, %v2994_v16  ;;  %v874_v25 = vsub.f32 0.0, %v858_v62 }
 0x137   : > { %3772 = vst [vmem:[#allocation35_spill] sm:$0xff] %v2982_v35  ;;  %v866_v59 = vand.u32 2147483647, %v2997_v7  ;;  %v867_v20 = vand.u32 2147483647, %v3008_v39  ;;  %v875_v53 = vsub.f32 0.0, %v859_v41 }
 0x138   : > { %3773 = vst [vmem:[#allocation36_spill] sm:$0xff] %v2984_v38  ;;  %v868_v46 = vand.u32 2147483647, %v3011_v24  ;;  %v885_v40 = vmul.f32 1.442695, %v2944_v28  ;;  %v876_v45 = vsub.f32 0.0, %v860_v47  ;;  %v3045_v28 = vmul.f32 %v2967_v54, %v2934_v31 }
 0x139   : > { %3774 = vst [vmem:[#allocation37_spill] sm:$0xff] %v2986_v19  ;;  %v877_v10 = vsub.f32 0.0, %v861_v4  ;;  %v887_v63 = vmul.f32 1.442695, %v2946_v18  ;;  %v878_v5 = vsub.f32 0.0, %v862_v21  ;;  %v879_v6 = vsub.f32 0.0, %v863_v1 }
 0x13a   : > { %3775 = vst [vmem:[#allocation38_spill] sm:$0xff] %v2988_v57  ;;  %v880_v29 = vsub.f32 0.0, %v864_v27  ;;  %v889_v50 = vmul.f32 1.442695, %v2950_v26  ;;  %v881_v17 = vsub.f32 0.0, %v865_v33  ;;  %v882_v34 = vsub.f32 0.0, %v866_v59 }
 0x13b   : > { %3776 = vst [vmem:[#allocation39_spill] sm:$0xff] %v2999_v32  ;;  %v883_v9 = vsub.f32 0.0, %v867_v20  ;;  %v891_v42 = vmul.f32 1.442695, %v872_v22  ;;  %v884_v60 = vsub.f32 0.0, %v868_v46  ;;  %1789 = vpow2.f32 %v885_v40 }
 0x13c   : > { %3777 = vst [vmem:[#allocation40_spill] sm:$0xff] %v3001_v13  ;;  %v893_v44 = vmul.f32 1.442695, %v873_v0  ;;  %1791 = vpow2.f32 %v887_v63  ;;  %v895_v62 = vmul.f32 1.442695, %v874_v25  ;;  %v917_v20 = vmax.f32 %v2923_v55, 0.0 }
 0x13d   : > { %3778 = vst [vmem:[#allocation41_spill] sm:$0xff] %v3003_v12  ;;  %v897_v41 = vmul.f32 1.442695, %v875_v53  ;;  %v899_v18 = vmul.f32 1.442695, %v876_v45  ;;  %1793 = vpow2.f32 %v889_v50  ;;  %v918_v22 = vmax.f32 %v2926_v56, 0.0 }
 0x13e   : > { %3779 = vst [vmem:[#allocation42_spill] sm:$0xff] %v3005_v61  ;;  %v901_v47 = vmul.f32 1.442695, %v877_v10  ;;  %v903_v4 = vmul.f32 1.442695, %v878_v5  ;;  %1795 = vpow2.f32 %v891_v42  ;;  %v919_v46 = vmax.f32 %v2929_v49, 0.0 }
 0x13f   : > { %3780 = vst [vmem:[#allocation43_spill] sm:$0xff] %v3013_v30  ;;  %v905_v21 = vmul.f32 1.442695, %v879_v6  ;;  %v907_v26 = vmul.f32 1.442695, %v880_v29  ;;  %1797 = vpow2.f32 %v893_v44  ;;  %v920_v0 = vmax.f32 %v2934_v31, 0.0 }
 0x140   : > { %3781 = vst [vmem:[#allocation44_spill] sm:$0xff] %v3015_v11  ;;  %v909_v1 = vmul.f32 1.442695, %v881_v17  ;;  %v911_v27 = vmul.f32 1.442695, %v882_v34  ;;  %1799 = vpow2.f32 %v895_v62  ;;  %v921_v42 = vmax.f32 %v2938_v43, 0.0 }
 0x141   : > { %v913_v33 = vmul.f32 1.442695, %v883_v9  ;;  %v915_v59 = vmul.f32 1.442695, %v884_v60  ;;  %v3051_v25 = vpop.eup %1789  ;;  %1801 = vpow2.f32 %v897_v41  ;;  %v922_v40 = vmax.f32 %v2957_v8, 0.0 }
 0x142   : > { %v923_v53 = vmax.f32 %v2960_v15, 0.0  ;;  %v3056_v9 = vpop.eup %1791  ;;  %1803 = vpow2.f32 %v899_v18  ;;  %v924_v55 = vmax.f32 %v2963_v3, 0.0  ;;  %v925_v56 = vmax.f32 %v2974_v51, 0.0 }
 0x143   : > { %v926_v49 = vmax.f32 %v2977_v23, 0.0  ;;  %v3061_v60 = vpop.eup %1793  ;;  %1805 = vpow2.f32 %v901_v47  ;;  %v927_v31 = vmax.f32 %v2980_v58, 0.0  ;;  %v928_v45 = vmax.f32 %v2991_v52, 0.0 }
 0x144   : > { %v929_v10 = vmax.f32 %v2994_v16, 0.0  ;;  %v3066_v63 = vpop.eup %1795  ;;  %1807 = vpow2.f32 %v903_v4  ;;  %v930_v5 = vmax.f32 %v2997_v7, 0.0  ;;  %v931_v6 = vmax.f32 %v3008_v39, 0.0 }
 0x145   : > { %v3071_v50 = vpop.eup %1797  ;;  %1809 = vpow2.f32 %v905_v21  ;;  %v937_v17 = vmul.f32 %v2969_v36, %v2938_v43  ;;  %v938_v34 = vmul.f32 %v2971_v2, %v2957_v8  ;;  %v939_v44 = vmul.f32 %v2982_v35, %v2960_v15 }
 0x146   : > { %v3079_v62 = vpop.eup %1799  ;;  %1811 = vpow2.f32 %v907_v26  ;;  %v940_v41 = vmul.f32 %v2984_v38, %v2963_v3  ;;  %v941_v18 = vmul.f32 %v2986_v19, %v2974_v51  ;;  %v942_v47 = vmul.f32 %v2988_v57, %v2977_v23 }
 0x147   : > { %v3087_v4 = vpop.eup %1801  ;;  %1813 = vpow2.f32 %v909_v1  ;;  %v943_v43 = vmul.f32 %v2999_v32, %v2980_v58  ;;  %v944_v8 = vmul.f32 %v3001_v13, %v2991_v52  ;;  %v945_v15 = vmul.f32 %v3003_v12, %v2994_v16 }
 0x148   : > { %v3095_v21 = vpop.eup %1803  ;;  %1815 = vpow2.f32 %v911_v27  ;;  %v946_v3 = vmul.f32 %v3005_v61, %v2997_v7  ;;  %v947_v51 = vmul.f32 %v3013_v30, %v3008_v39  ;;  %v948_v23 = vmul.f32 %v3015_v11, %v3011_v24 }
 0x149   : > { %v3103_v26 = vpop.eup %1805  ;;  %1817 = vpow2.f32 %v913_v33  ;;  %v3106_v58 = vsub.f32 %v917_v20, %v3024_v37  ;;  %v3109_v52 = vsub.f32 %v918_v22, %v3031_v14  ;;  %v965_v16 = vadd.f32 1.0, %v3051_v25 }
 0x14a   : > { %v3112_v1 = vpop.eup %1807  ;;  %v3115_v7 = vsub.f32 %v919_v46, %v3037_v48  ;;  %v3118_v39 = vsub.f32 %v920_v0, %v3045_v28  ;;  %v3120_v27 = vsub.f32 %v921_v42, %v937_v17  ;;  %v974_v33 = vadd.f32 1.0, %v3056_v9 }
 0x14b   : > { %v3123_v29 = vpop.eup %1809  ;;  %1819 = vpow2.f32 %v915_v59  ;;  %v3125_v37 = vsub.f32 %v922_v40, %v938_v34  ;;  %v3127_v14 = vsub.f32 %v923_v53, %v939_v44  ;;  %v983_v20 = vadd.f32 1.0, %v3061_v60 }
 0x14c   : > { %v3130_v22 = vpop.eup %1811  ;;  %v3132_v48 = vsub.f32 %v924_v55, %v940_v41  ;;  %v3134_v46 = vsub.f32 %v925_v56, %v941_v18  ;;  %v3136_v28 = vsub.f32 %v926_v49, %v942_v47  ;;  %v968_v0 = vmul.f32 -0.5, %v3051_v25 }
 0x14d   : > { %v3139_v42 = vpop.eup %1813  ;;  %v3141_v17 = vsub.f32 %v927_v31, %v943_v43  ;;  %v3143_v59 = vsub.f32 %v928_v45, %v944_v8  ;;  %1821 = vlog2.f32 %v965_v16  ;;  %v992_v40 = vadd.f32 1.0, %v3066_v63 }
 0x14e   : > { %3782 = vst [vmem:[#allocation45_spill] sm:$0xff] %v3136_v28  ;;  %v3146_v53 = vpop.eup %1815  ;;  %v3148_v34 = vsub.f32 %v929_v10, %v945_v15  ;;  %v971_v55 = vand.u32 2147483647, %v3051_v25  ;;  %1823 = vlog2.f32 %v974_v33  ;;  %v977_v56 = vmul.f32 -0.5, %v3056_v9 }
 0x14f   : > { %3783 = vst [vmem:[#allocation46_spill] sm:$0xff] %v3141_v17  ;;  %v3152_v49 = vpop.eup %1817  ;;  %v3154_v44 = vsub.f32 %v930_v5, %v946_v3  ;;  %1825 = vlog2.f32 %v983_v20  ;;  %v986_v31 = vmul.f32 -0.5, %v3061_v60  ;;  %v1001_v45 = vadd.f32 1.0, %v3071_v50 }
 0x150   : > { %3784 = vst [vmem:[#allocation47_spill] sm:$0xff] %v3143_v59  ;;  %v969_v41 = vadd.f32 1.0, %v968_v0  ;;  %v980_v18 = vand.u32 2147483647, %v3056_v9  ;;  %v995_v10 = vmul.f32 -0.5, %v3066_v63  ;;  %v1004_v47 = vmul.f32 -0.5, %v3071_v50 }
 0x151   : > { %3785 = vst [vmem:[#allocation48_spill] sm:$0xff] %v3148_v34  ;;  %v3161_v43 = vpop.eup %1819  ;;  %v3163_v8 = vsub.f32 %v931_v6, %v947_v51  ;;  %v989_v15 = vand.u32 2147483647, %v3061_v60  ;;  %1827 = vlog2.f32 %v992_v40  ;;  %v1010_v5 = vadd.f32 1.0, %v3079_v62 }
 0x152   : > { %3786 = vst [vmem:[#allocation49_spill] sm:$0xff] %v3154_v44  ;;  %v3788_v3 = vmax.f32 %v3011_v24, 0.0  ;;  %vm3171_vm0 = vcmp.lt.f32.partialorder %v971_v55, 0.0004427343  ;;  %v978_v20 = vadd.f32 1.0, %v977_v56  ;;  %v987_v30 = vadd.f32 1.0, %v986_v31 }
 0x153   : > { %3787 = vst [vmem:[#allocation50_spill] sm:$0xff] %v3163_v8  ;;  %v998_v0 = vand.u32 2147483647, %v3066_v63  ;;  %v1822_v11 = vpop.eup %1821  ;;  %1829 = vlog2.f32 %v1001_v45  ;;  %v1007_v6 = vand.u32 2147483647, %v3071_v50  ;;  %v1013_v51 = vmul.f32 -0.5, %v3079_v62 }
 0x154   : > { %v3169_v16 = vsub.f32 %v3788_v3, %v948_v23  ;;  %v1824_v40 = vpop.eup %1823  ;;  %v3179_v61 = vmul.f32 %v3051_v25, %v969_v41  ;;  %vm3181_vm1 = vcmp.lt.f32.partialorder %v980_v18, 0.0004427343  ;;  %v996_v23 = vadd.f32 1.0, %v995_v10 }
 0x155   : > { %v1005_v55 = vadd.f32 1.0, %v1004_v47  ;;  %v1826_v56 = vpop.eup %1825  ;;  %vm3185_vm2 = vcmp.lt.f32.partialorder %v989_v15, 0.0004427343  ;;  %1831 = vlog2.f32 %v1010_v5  ;;  %v1016_v31 = vand.u32 2147483647, %v3079_v62 }
 0x156   : > { %3789 = vst [vmem:[#allocation51_spill] sm:$0xff] %v3169_v16  ;;  %v1019_v45 = vadd.f32 1.0, %v3087_v4  ;;  %v3191_v12 = vmul.f32 0.6931472, %v1822_v11  ;;  %v3194_v25 = vmul.f32 %v3056_v9, %v978_v20  ;;  %vm3196_vm3 = vcmp.lt.f32.partialorder %v998_v0, 0.0004427343 }
 0x157   : > { %v1022_v18 = vmul.f32 -0.5, %v3087_v4  ;;  %v1828_v10 = vpop.eup %1827  ;;  %v3201_v47 = vmul.f32 0.6931472, %v1824_v40  ;;  %v3204_v15 = vmul.f32 %v3061_v60, %v987_v30  ;;  %vm3206_vm4 = vcmp.lt.f32.partialorder %v1007_v6, 0.0004427343 }
 0x158   : > { %v1014_v11 = vadd.f32 1.0, %v1013_v51  ;;  %v3210_v13 = vmul.f32 0.6931472, %v1826_v56  ;;  %v3213_v9 = vmul.f32 %v3066_v63, %v996_v23  ;;  %v3216_v20 = vmul.f32 %v3071_v50, %v1005_v55 }
 0x159   : > { %v1028_v0 = vadd.f32 1.0, %v3095_v21  ;;  %v1830_v40 = vpop.eup %1829  ;;  %vm3219_vm5 = vcmp.lt.f32.partialorder %v1016_v31, 0.0004427343  ;;  %1833 = vlog2.f32 %v1019_v45  ;;  %v1031_v30 = vmul.f32 -0.5, %v3095_v21 }
 0x15a   : > { %v1037_v60 = vadd.f32 1.0, %v3103_v26  ;;  %v3229_v6 = vmul.f32 0.6931472, %v1828_v10  ;;  %v1023_v50 = vadd.f32 1.0, %v1022_v18  ;;  %v1025_v51 = vand.u32 2147483647, %v3087_v4 }
 0x15b   : > { %v1832_v23 = vpop.eup %1831  ;;  %v3237_v56 = vmul.f32 %v3079_v62, %v1014_v11  ;;  %v1034_v31 = vand.u32 2147483647, %v3095_v21  ;;  %v1046_v45 = vadd.f32 1.0, %v3112_v1  ;;  %v3245_v10 = vmul.f32 0.6931472, %v1830_v40 }
 0x15c   : > { %1835 = vlog2.f32 %v1028_v0  ;;  %v1040_v63 = vmul.f32 -0.5, %v3103_v26  ;;  %v1032_v57 = vadd.f32 1.0, %v1031_v30  ;;  %v1049_v55 = vmul.f32 -0.5, %v3112_v1 }
 0x15d   : > { %1837 = vlog2.f32 %v1037_v60  ;;  %v1055_v62 = vadd.f32 1.0, %v3123_v29  ;;  %v3254_v19 = vmul.f32 0.6931472, %v1832_v23  ;;  %v3257_v18 = vmul.f32 %v3087_v4, %v1023_v50 }
 0x15e   : > { %vm3259_vm6 = vcmp.lt.f32.partialorder %v1025_v51, 0.0004427343  ;;  %vm3263_vm7 = vcmp.lt.f32.partialorder %v1034_v31, 0.0004427343  ;;  %v1043_v60 = vand.u32 2147483647, %v3103_v26  ;;  %1839 = vlog2.f32 %v1046_v45 }
 0x15f   : > { %v1834_v40 = vpop.eup %1833  ;;  %v1064_v38 = vadd.f32 1.0, %v3130_v22  ;;  %v1041_v50 = vadd.f32 1.0, %v1040_v63  ;;  %v1052_v51 = vand.u32 2147483647, %v3112_v1  ;;  %v1073_v23 = vadd.f32 1.0, %v3139_v42 }
 0x160   : > { %v3276_v31 = vmul.f32 %v3095_v21, %v1032_v57  ;;  %v1050_v11 = vadd.f32 1.0, %v1049_v55  ;;  %1841 = vlog2.f32 %v1055_v62  ;;  %v1082_v35 = vadd.f32 1.0, %v3146_v53 }
 0x161   : > { %v3283_v36 = vmul.f32 0.6931472, %v1834_v40  ;;  %v1058_v63 = vmul.f32 -0.5, %v3123_v29  ;;  %v1091_v4 = vadd.f32 1.0, %v3152_v49  ;;  %vm3287_vm8 = vcmp.lt.f32.partialorder %v1043_v60, 0.0004427343 }
 0x162   : > { %v1836_v45 = vpop.eup %1835  ;;  %1843 = vlog2.f32 %v1064_v38  ;;  %v1067_v21 = vmul.f32 -0.5, %v3130_v22  ;;  %v1100_v55 = vadd.f32 1.0, %v3161_v43  ;;  %v3294_v62 = vmul.f32 %v3103_v26, %v1041_v50 }
 0x163   : > { %v1838_v54 = vpop.eup %1837  ;;  %vm3296_vm9 = vcmp.lt.f32.partialorder %v1052_v51, 0.0004427343  ;;  %1845 = vlog2.f32 %v1073_v23  ;;  %v1076_v2 = vmul.f32 -0.5, %v3139_v42  ;;  %v3301_v60 = vmul.f32 0.6931472, %v1836_v45 }
 0x164   : > { %v1840_v16 = vpop.eup %1839  ;;  %v3304_v8 = vmul.f32 %v3112_v1, %v1050_v11  ;;  %v1061_v38 = vand.u32 2147483647, %v3123_v29  ;;  %1847 = vlog2.f32 %v1082_v35  ;;  %v1039_v44 = vmul.f32 0.6931472, %v1838_v54 }
 0x165   : > { %v1059_v34 = vadd.f32 1.0, %v1058_v63  ;;  %v1085_v26 = vmul.f32 -0.5, %v3146_v53  ;;  %1849 = vlog2.f32 %v1091_v4  ;;  %v1068_v51 = vadd.f32 1.0, %v1067_v21 }
 0x166   : > { %v1842_v50 = vpop.eup %1841  ;;  %v1070_v23 = vand.u32 2147483647, %v3130_v22  ;;  %v1094_v59 = vmul.f32 -0.5, %v3152_v49  ;;  %1851 = vlog2.f32 %v1100_v55  ;;  %v1048_v45 = vmul.f32 0.6931472, %v1840_v16 }
 0x167   : > { %v1077_v17 = vadd.f32 1.0, %v1076_v2  ;;  %v1079_v1 = vand.u32 2147483647, %v3139_v42  ;;  %v1103_v11 = vmul.f32 -0.5, %v3161_v43  ;;  %v1027_v54 = vsel %vm3259_vm6, %v3257_v18, %v3283_v36 }
 0x168   : > { %v1844_v28 = vpop.eup %1843  ;;  %v1036_v35 = vsel %vm3263_vm7, %v3276_v31, %v3301_v60  ;;  %vm3320_vm10 = vcmp.lt.f32.partialorder %v1061_v38, 0.0004427343  ;;  %v1088_v2 = vand.u32 2147483647, %v3146_v53  ;;  %v1045_v63 = vsel %vm3287_vm8, %v3294_v62, %v1039_v44 }
 0x169   : > { %v1846_v16 = vpop.eup %1845  ;;  %v1057_v21 = vmul.f32 0.6931472, %v1842_v50  ;;  %v1060_v0 = vmul.f32 %v3123_v29, %v1059_v34  ;;  %v1086_v36 = vadd.f32 1.0, %v1085_v26  ;;  %v1069_v55 = vmul.f32 %v3130_v22, %v1068_v51 }
 0x16a   : > { %v1848_v18 = vpop.eup %1847  ;;  %vm3330_vm11 = vcmp.lt.f32.partialorder %v1070_v23, 0.0004427343  ;;  %v1095_v31 = vadd.f32 1.0, %v1094_v59  ;;  %v1097_v60 = vand.u32 2147483647, %v3152_v49  ;;  %v1054_v57 = vsel %vm3296_vm9, %v3304_v8, %v1048_v45  ;;  %v3829_v45 = vld [vmem:[#allocation46_spill] sm:$0xff] }
 0x16b   : > { %v1850_v38 = vpop.eup %1849  ;;  %v1078_v44 = vmul.f32 %v3139_v42, %v1077_v17  ;;  %vm3339_vm12 = vcmp.lt.f32.partialorder %v1079_v1, 0.0004427343  ;;  %v1104_v34 = vadd.f32 1.0, %v1103_v11  ;;  %v1066_v62 = vmul.f32 0.6931472, %v1844_v28 }
 0x16c   : > { %v1852_v22 = vpop.eup %1851  ;;  %vm3343_vm13 = vcmp.lt.f32.partialorder %v1088_v2, 0.0004427343  ;;  %v1106_v59 = vand.u32 2147483647, %v3161_v43  ;;  %v3818_v8 = vsel %vm3171_vm0, %v3179_v61, %v3191_v12  ;;  %v1063_v17 = vsel %vm3320_vm10, %v1060_v0, %v1057_v21  ;;  %v3832_v2 = vld [vmem:[#allocation49_spill] sm:$0xff]  ;;  %v3833_v0 = vld [vmem:[#allocation50_spill] sm:$0xff] }
 0x16d   : > { %v3354_v42 = vadd.f32 %v3818_v8, %v3106_v58  ;;  %v1075_v40 = vmul.f32 0.6931472, %v1846_v16  ;;  %v1087_v28 = vmul.f32 %v3146_v53, %v1086_v36  ;;  %v3819_v50 = vsel %vm3181_vm1, %v3194_v25, %v3201_v47 }
 0x16e   : > { %v3365_v51 = vadd.f32 %v3819_v50, %v3109_v52  ;;  %v1084_v33 = vmul.f32 0.6931472, %v1848_v18  ;;  %v1096_v23 = vmul.f32 %v3152_v49, %v1095_v31  ;;  %vm3368_vm14 = vcmp.lt.f32.partialorder %v1097_v60, 0.0004427343  ;;  %v3834_v18 = vld [vmem:[#allocation51_spill] sm:$0xff] }
 0x16f   : > { %v3822_v61 = vsel %vm3185_vm2, %v3204_v15, %v3210_v13  ;;  %v1093_v53 = vmul.f32 0.6931472, %v1850_v38  ;;  %v1102_v24 = vmul.f32 0.6931472, %v1852_v22  ;;  %v1105_v52 = vmul.f32 %v3161_v43, %v1104_v34 }
 0x170   : > { %v3378_v58 = vadd.f32 %v3822_v61, %v3115_v7  ;;  %v3823_v49 = vsel %vm3196_vm3, %v3213_v9, %v3229_v6  ;;  %v1072_v3 = vsel %vm3330_vm11, %v1069_v55, %v1066_v62  ;;  %vm3391_vm15 = vcmp.lt.f32.partialorder %v1106_v59, 0.0004427343 }
 0x171   : > { %v3387_v25 = vadd.f32 %v3823_v49, %v3118_v39  ;;  %v3826_v13 = vsel %vm3206_vm4, %v3216_v20, %v3245_v10  ;;  %v1125_v43 = vsub.f32 0.0, %v3354_v42  ;;  %v1081_v39 = vsel %vm3339_vm12, %v1078_v44, %v1075_v40 }
 0x172   : > { %v3401_v7 = vadd.f32 %v3826_v13, %v3120_v27  ;;  %v3827_v41 = vsel %vm3219_vm5, %v3237_v56, %v3254_v19  ;;  %v3415_v5 = vadd.f32 %v1027_v54, %v3127_v14  ;;  %v1126_v9 = vsub.f32 0.0, %v3365_v51  ;;  %v3828_v14 = vld [vmem:[#allocation45_spill] sm:$0xff] }
 0x173   : > { %v3412_v15 = vadd.f32 %v3827_v41, %v3125_v37  ;;  %v1090_v27 = vsel %vm3343_vm13, %v1087_v28, %v1084_v33  ;;  %v3421_v20 = vadd.f32 %v1036_v35, %v3132_v48  ;;  %v3424_v6 = vadd.f32 %v1045_v63, %v3134_v46  ;;  %v3830_v48 = vld [vmem:[#allocation47_spill] sm:$0xff]  ;;  %v3831_v35 = vld [vmem:[#allocation48_spill] sm:$0xff] }
 0x174   : > { %v1127_v32 = vsub.f32 0.0, %v3378_v58  ;;  %v1099_v19 = vsel %vm3368_vm14, %v1096_v23, %v1093_v53  ;;  %v1108_v37 = vsel %vm3391_vm15, %v1105_v52, %v1102_v24  ;;  %v3432_v56 = vadd.f32 %v1054_v57, %v3828_v14  ;;  %v3835_v23 = vld [vmem:[#allocation29_spill] sm:$0xff]  ;;  %v3837_v41 = vld [vmem:[#allocation31_spill] sm:$0xff] }
 0x175   : > { %v1128_v10 = vsub.f32 0.0, %v3387_v25  ;;  %v3436_v1 = vadd.f32 %v1063_v17, %v3829_v45  ;;  %v3439_v11 = vadd.f32 %v1072_v3, %v3830_v48  ;;  %v1129_v46 = vsub.f32 0.0, %v3401_v7  ;;  %v3841_v48 = vld [vmem:[#allocation35_spill] sm:$0xff] }
 0x176   : > { %v1141_v54 = vmul.f32 1.442695, %v1125_v43  ;;  %v3443_v4 = vadd.f32 %v1081_v39, %v3831_v35  ;;  %v3446_v16 = vadd.f32 %v1090_v27, %v3832_v2  ;;  %v1130_v63 = vsub.f32 0.0, %v3412_v15  ;;  %v3836_v43 = vld [vmem:[#allocation30_spill] sm:$0xff]  ;;  %v3838_v27 = vld [vmem:[#allocation32_spill] sm:$0xff] }
 0x177   : > { %v1143_v21 = vmul.f32 1.442695, %v1126_v9  ;;  %v3450_v36 = vadd.f32 %v1099_v19, %v3833_v0  ;;  %v3453_v55 = vadd.f32 %v1108_v37, %v3834_v18  ;;  %v1131_v30 = vsub.f32 0.0, %v3415_v5  ;;  %v3839_v37 = vld [vmem:[#allocation33_spill] sm:$0xff]  ;;  %v3844_v18 = vld [vmem:[#allocation38_spill] sm:$0xff] }
 0x178   : > { %v1145_v31 = vmul.f32 1.442695, %v1127_v32  ;;  %v1132_v60 = vsub.f32 0.0, %v3421_v20  ;;  %v1133_v38 = vsub.f32 0.0, %v3424_v6  ;;  %v1134_v57 = vsub.f32 0.0, %v3432_v56 }
 0x179   : > { %v1147_v44 = vmul.f32 1.442695, %v1128_v10  ;;  %v1135_v29 = vsub.f32 0.0, %v3436_v1  ;;  %v1136_v34 = vsub.f32 0.0, %v3439_v11  ;;  %1853 = vpow2.f32 %v1141_v54  ;;  %v3840_v10 = vld [vmem:[#allocation34_spill] sm:$0xff]  ;;  %v3842_v54 = vld [vmem:[#allocation36_spill] sm:$0xff] }
 0x17a   : > { %v1149_v22 = vmul.f32 1.442695, %v1129_v46  ;;  %v1137_v62 = vsub.f32 0.0, %v3443_v4  ;;  %v1138_v26 = vsub.f32 0.0, %v3446_v16  ;;  %1855 = vpow2.f32 %v1143_v21  ;;  %v3843_v21 = vld [vmem:[#allocation37_spill] sm:$0xff] }
 0x17b   : > { %v1151_v59 = vmul.f32 1.442695, %v1130_v63  ;;  %v1139_v8 = vsub.f32 0.0, %v3450_v36  ;;  %v1140_v17 = vsub.f32 0.0, %v3453_v55  ;;  %1857 = vpow2.f32 %v1145_v31 }
 0x17c   : > { %v1153_v40 = vmul.f32 1.442695, %v1131_v30  ;;  %1859 = vpow2.f32 %v1147_v44  ;;  %v1155_v28 = vmul.f32 1.442695, %v1132_v60  ;;  %v1157_v50 = vmul.f32 1.442695, %v1133_v38 }
 0x17d   : > { %1861 = vpow2.f32 %v1149_v22  ;;  %v1159_v33 = vmul.f32 1.442695, %v1134_v57  ;;  %v1189_v12 = vmul.f32 0.5, %v3835_v23  ;;  %v1161_v61 = vmul.f32 1.442695, %v1135_v29  ;;  %v3845_v38 = vld [vmem:[#allocation39_spill] sm:$0xff] }
 0x17e   : > { %1863 = vpow2.f32 %v1151_v59  ;;  %v1163_v53 = vmul.f32 1.442695, %v1136_v34  ;;  %v1165_v24 = vmul.f32 1.442695, %v1137_v62  ;;  %v1167_v49 = vmul.f32 1.442695, %v1138_v26 }
 0x17f   : > { %v1854_v52 = vpop.eup %1853  ;;  %1865 = vpow2.f32 %v1153_v40  ;;  %v1169_v3 = vmul.f32 1.442695, %v1139_v8  ;;  %v1171_v47 = vmul.f32 1.442695, %v1140_v17  ;;  %v1190_v39 = vmul.f32 0.5, %v3836_v43  ;;  %v3846_v44 = vld [vmem:[#allocation40_spill] sm:$0xff] }
 0x180   : > { %v1856_v13 = vpop.eup %1855  ;;  %1867 = vpow2.f32 %v1155_v28  ;;  %v1191_v9 = vmul.f32 0.5, %v3837_v41  ;;  %v1192_v32 = vmul.f32 0.5, %v3838_v27  ;;  %v1193_v14 = vmul.f32 0.5, %v3839_v37  ;;  %v3847_v62 = vld [vmem:[#allocation41_spill] sm:$0xff]  ;;  %v3848_v59 = vld [vmem:[#allocation42_spill] sm:$0xff]  ;;  %v3849_v17 = vld [vmem:[#allocation43_spill] sm:$0xff] }
 0x181   : > { %v1858_v19 = vpop.eup %1857  ;;  %v1194_v45 = vmul.f32 0.5, %v3840_v10  ;;  %v1195_v46 = vmul.f32 0.5, %v3841_v48  ;;  %v1196_v35 = vmul.f32 0.5, %v3842_v54  ;;  %1869 = vpow2.f32 %v1157_v50  ;;  %v3850_v23 = vld [vmem:[#allocation44_spill] sm:$0xff] }
 0x182   : > { %v1860_v2 = vpop.eup %1859  ;;  %v1173_v63 = vsub.f32 1.0, %v1854_v52  ;;  %v1197_v0 = vmul.f32 0.5, %v3843_v21  ;;  %v1198_v30 = vmul.f32 0.5, %v3844_v18  ;;  %1871 = vpow2.f32 %v1159_v33 }
 0x183   : > { %v3475_v31 = vpop.eup %1861  ;;  %v1174_v60 = vsub.f32 1.0, %v1856_v13  ;;  %v1199_v57 = vmul.f32 0.5, %v3845_v38  ;;  %v1200_v29 = vmul.f32 0.5, %v3846_v44  ;;  %v1175_v22 = vsub.f32 1.0, %v1858_v19 }
 0x184   : > { %v3479_v34 = vpop.eup %1863  ;;  %v1201_v26 = vmul.f32 0.5, %v3847_v62  ;;  %v1202_v8 = vmul.f32 0.5, %v3848_v59  ;;  %v1203_v40 = vmul.f32 0.5, %v3849_v17  ;;  %1873 = vpow2.f32 %v1161_v61 }
 0x185   : > { %v3484_v28 = vpop.eup %1865  ;;  %v1176_v50 = vsub.f32 1.0, %v1860_v2  ;;  %v1204_v33 = vmul.f32 0.5, %v3850_v23  ;;  %v1205_v52 = vadd.f32 0.25, %v1189_v12  ;;  %1875 = vpow2.f32 %v1163_v53 }
 0x186   : > { %v3487_v13 = vpop.eup %1867  ;;  %v1177_v43 = vsub.f32 1.0, %v3475_v31  ;;  %v1206_v41 = vadd.f32 0.25, %v1190_v39  ;;  %v1270_v27 = vlaneseq  ;;  %1877 = vpow2.f32 %v1165_v24 }
 0x187   : > { %v1178_v19 = vsub.f32 1.0, %v3479_v34  ;;  %v1207_v37 = vadd.f32 0.25, %v1191_v9  ;;  %v1208_v10 = vadd.f32 0.25, %v1192_v32  ;;  %v1870_v48 = vpop.eup %1869  ;;  %1879 = vpow2.f32 %v1167_v49 }
 0x188   : > { %v1179_v61 = vsub.f32 1.0, %v3484_v28  ;;  %v1209_v54 = vadd.f32 0.25, %v1193_v14  ;;  %v3492_v2 = vshrl.u32 %v1270_v27, 7  ;;  %v3494_v12 = vpop.eup %1871  ;;  %1881 = vpow2.f32 %v1169_v3 }
 0x189   : > { %v1180_v53 = vsub.f32 1.0, %v3487_v13  ;;  %v1210_v39 = vadd.f32 0.25, %v1194_v45  ;;  %v3497_v21 = vadd.f32 0.25, %v1195_v46  ;;  %v3499_v24 = vadd.f32 0.25, %v1196_v35 }
 0x18a   : > { %v3501_v9 = vadd.f32 0.25, %v1197_v0  ;;  %v1221_v32 = vmul.f32 %v1173_v63, %v1173_v63  ;;  %v1222_v49 = vmul.f32 %v1174_v60, %v1174_v60  ;;  %v3503_v18 = vpop.eup %1873  ;;  %1883 = vpow2.f32 %v1171_v47 }
 0x18b   : > { %v1181_v14 = vsub.f32 1.0, %v1870_v48  ;;  %v3505_v31 = vadd.f32 0.25, %v1198_v30  ;;  %v1272_v3 = vadd.s32 8, %v3492_v2  ;;  %v3508_v38 = vpop.eup %1875  ;;  %v1182_v45 = vsub.f32 1.0, %v3494_v12 }
 0x18c   : > { %v3511_v46 = vadd.f32 0.25, %v1199_v57  ;;  %v1223_v35 = vmul.f32 %v1175_v22, %v1175_v22  ;;  %v3515_v0 = vstv %s1504_s3  ;;  %v3517_v63 = vpop.eup %1877  ;;  %v3519_v60 = vadd.f32 0.25, %v1200_v29 }
 0x18d   : > { %v3521_v47 = vadd.f32 0.25, %v1201_v26  ;;  %v3523_v30 = vadd.f32 0.25, %v1202_v8  ;;  %v1273_v44 = vadd.s32 16, %v3492_v2  ;;  %v3526_v34 = vpop.eup %1879  ;;  %v1183_v62 = vsub.f32 1.0, %v3503_v18 }
 0x18e   : > { %v1224_v57 = vmul.f32 %v1176_v50, %v1176_v50  ;;  %v1237_v59 = vmul.f32 %v1221_v32, %v1205_v52  ;;  %v1238_v22 = vmul.f32 %v1222_v49, %v1206_v41  ;;  %v3529_v17 = vpop.eup %1881  ;;  %v3531_v28 = vadd.f32 0.25, %v1203_v40 }
 0x18f   : > { %v1274_v29 = vadd.s32 24, %v3492_v2  ;;  %v1288_v26 = vadd.s32 %v3515_v0, %v3492_v2  ;;  %v1289_v8 = vadd.s32 %v3515_v0, %v1272_v3  ;;  %v1184_v23 = vsub.f32 1.0, %v3508_v38 }
 0x190   : > { %v3538_v13 = vadd.f32 0.25, %v1204_v33  ;;  %v1225_v27 = vmul.f32 %v1177_v43, %v1177_v43  ;;  %v1239_v48 = vmul.f32 %v1223_v35, %v1207_v37  ;;  %v3540_v50 = vpop.eup %1883  ;;  %v1185_v52 = vsub.f32 1.0, %v3517_v63 }
 0x191   : > { %v1226_v41 = vmul.f32 %v1178_v19, %v1178_v19  ;;  %v1275_v40 = vadd.s32 32, %v3492_v2  ;;  %v1290_v12 = vadd.s32 %v3515_v0, %v1273_v44  ;;  %v1227_v32 = vmul.f32 %v1179_v61, %v1179_v61 }
 0x192   : > { %v1240_v49 = vmul.f32 %v1224_v57, %v1208_v10  ;;  %v1253_v18 = vmul.f32 %v1237_v59, %v3354_v42  ;;  %v1254_v3 = vmul.f32 %v1238_v22, %v3365_v51  ;;  %v1276_v33 = vadd.s32 40, %v3492_v2 }
 0x193   : > { %v1291_v43 = vadd.s32 %v3515_v0, %v1274_v29  ;;  %vm1304_vm0 = vcmp.lt.s32.totalorder %v1288_v26, 781  ;;  %vm1305_vm1 = vcmp.lt.s32.totalorder %v1289_v8, 781  ;;  %v1186_v37 = vsub.f32 1.0, %v3526_v34 }
 0x194   : > { %v1228_v38 = vmul.f32 %v1180_v53, %v1180_v53  ;;  %v1241_v19 = vmul.f32 %v1225_v27, %v1209_v54  ;;  %v1255_v35 = vmul.f32 %v1239_v48, %v3378_v58  ;;  %v1229_v63 = vmul.f32 %v1181_v14, %v1181_v14 }
 0x195   : > { %v1277_v61 = vadd.s32 48, %v3492_v2  ;;  %v1292_v10 = vadd.s32 %v3515_v0, %v1275_v40  ;;  %vm1306_vm2 = vcmp.lt.s32.totalorder %v1290_v12, 781  ;;  %v1242_v42 = vmul.f32 %v1226_v41, %v1210_v39 }
 0x196   : > { %v1256_v51 = vmul.f32 %v1240_v49, %v3387_v25  ;;  %v1320_v44 = vsel %vm1304_vm0, %v1253_v18, 0.0  ;;  %v1321_v57 = vsel %vm1305_vm1, %v1254_v3, 0.0  ;;  %v1230_v59 = vmul.f32 %v1182_v45, %v1182_v45 }
 0x197   : > { %v1278_v22 = vadd.s32 56, %v3492_v2  ;;  %v1293_v34 = vadd.s32 %v3515_v0, %v1276_v33  ;;  %vm1307_vm3 = vcmp.lt.s32.totalorder %v1291_v43, 781  ;;  %v1187_v54 = vsub.f32 1.0, %v3529_v17 }
 0x198   : > { %v1243_v58 = vmul.f32 %v1227_v32, %v3497_v21  ;;  %v1257_v53 = vmul.f32 %v1241_v19, %v3401_v7  ;;  %v1322_v14 = vsel %vm1306_vm2, %v1255_v35, 0.0  ;;  %v1279_v29 = vadd.s32 64, %v3492_v2 }
 0x199   : > { %v1294_v39 = vadd.s32 %v3515_v0, %v1277_v61  ;;  %vm1308_vm4 = vcmp.lt.s32.totalorder %v1292_v10, 781  ;;  %v1337_v25 = vadd.f32 %v1321_v57, %v1320_v44  ;;  %v1231_v26 = vmul.f32 %v1183_v62, %v1183_v62 }
 0x19a   : > { %v1244_v45 = vmul.f32 %v1228_v38, %v3499_v24  ;;  %v1258_v8 = vmul.f32 %v1242_v42, %v3412_v15  ;;  %v1323_v27 = vsel %vm1307_vm3, %v1256_v51, 0.0  ;;  %v1280_v48 = vadd.s32 72, %v3492_v2 }
 0x19b   : > { %v1295_v17 = vadd.s32 %v3515_v0, %v1278_v22  ;;  %vm1309_vm5 = vcmp.lt.s32.totalorder %v1293_v34, 781  ;;  %v1338_v21 = vadd.f32 %v1337_v25, %v1322_v14  ;;  %v1232_v7 = vmul.f32 %v1184_v23, %v1184_v23 }
 0x19c   : > { %v1245_v41 = vmul.f32 %v1229_v63, %v3501_v9  ;;  %v1259_v40 = vmul.f32 %v1243_v58, %v3415_v5  ;;  %v1324_v12 = vsel %vm1308_vm4, %v1257_v53, 0.0  ;;  %v1281_v32 = vadd.s32 80, %v3492_v2 }
 0x19d   : > { %v1296_v62 = vadd.s32 %v3515_v0, %v1279_v29  ;;  %vm1310_vm6 = vcmp.lt.s32.totalorder %v1294_v39, 781  ;;  %v1339_v24 = vadd.f32 %v1338_v21, %v1323_v27  ;;  %v1233_v15 = vmul.f32 %v1185_v52, %v1185_v52 }
 0x19e   : > { %v1246_v49 = vmul.f32 %v1230_v59, %v3505_v31  ;;  %v1260_v18 = vmul.f32 %v1244_v45, %v3421_v20  ;;  %v1325_v3 = vsel %vm1309_vm5, %v1258_v8, 0.0  ;;  %v1282_v33 = vadd.s32 88, %v3492_v2 }
 0x19f   : > { %v1297_v23 = vadd.s32 %v3515_v0, %v1280_v48  ;;  %vm1311_vm7 = vcmp.lt.s32.totalorder %v1295_v17, 781  ;;  %v1340_v9 = vadd.f32 %v1339_v24, %v1324_v12  ;;  %v1188_v5 = vsub.f32 1.0, %v3540_v50 }
 0x1a0   : > { %v1247_v43 = vmul.f32 %v1231_v26, %v3511_v46  ;;  %v1261_v38 = vmul.f32 %v1245_v41, %v3424_v6  ;;  %v1326_v19 = vsel %vm1310_vm6, %v1259_v40, 0.0  ;;  %v1283_v52 = vadd.s32 96, %v3492_v2  ;;  %v1336_v41 = vld [vmem:[%s2332_s24] sm:$0xff] }
 0x1a1   : > { %v1298_v31 = vadd.s32 %v3515_v0, %v1281_v32  ;;  %vm1312_vm8 = vcmp.lt.s32.totalorder %v1296_v62, 781  ;;  %v1341_v20 = vadd.f32 %v1340_v9, %v1325_v3  ;;  %v1234_v35 = vmul.f32 %v1186_v37, %v1186_v37 }
 0x1a2   : > { %v1248_v63 = vmul.f32 %v1232_v7, %v3519_v60  ;;  %v1262_v61 = vmul.f32 %v1246_v49, %v3432_v56  ;;  %v1327_v10 = vsel %vm1311_vm7, %v1260_v18, 0.0  ;;  %v1284_v42 = vadd.s32 104, %v3492_v2 }
 0x1a3   : > { %v1299_v50 = vadd.s32 %v3515_v0, %v1282_v33  ;;  %vm1313_vm9 = vcmp.lt.s32.totalorder %v1297_v23, 781  ;;  %v1342_v46 = vadd.f32 %v1341_v20, %v1326_v19  ;;  %v1235_v6 = vmul.f32 %v1187_v54, %v1187_v54 }
 0x1a4   : > { %v1249_v51 = vmul.f32 %v1233_v15, %v3521_v47  ;;  %v1263_v44 = vmul.f32 %v1247_v43, %v3436_v1  ;;  %v1328_v57 = vsel %vm1312_vm8, %v1261_v38, 0.0  ;;  %v1285_v59 = vadd.s32 112, %v3492_v2 }
 0x1a5   : > { %v1300_v37 = vadd.s32 %v3515_v0, %v1283_v52  ;;  %vm1314_vm10 = vcmp.lt.s32.totalorder %v1298_v31, 781  ;;  %v1343_v60 = vadd.f32 %v1342_v46, %v1327_v10  ;;  %v1236_v56 = vmul.f32 %v1188_v5, %v1188_v5 }
 0x1a6   : > { %v1250_v22 = vmul.f32 %v1234_v35, %v3523_v30  ;;  %v1264_v34 = vmul.f32 %v1248_v63, %v3439_v11  ;;  %v1329_v58 = vsel %vm1313_vm9, %v1262_v61, 0.0  ;;  %v1286_v53 = vadd.s32 120, %v3492_v2 }
 0x1a7   : > { %v1301_v54 = vadd.s32 %v3515_v0, %v1284_v42  ;;  %vm1315_vm11 = vcmp.lt.s32.totalorder %v1299_v50, 781  ;;  %v1344_v47 = vadd.f32 %v1343_v60, %v1328_v57  ;;  %v1251_v1 = vmul.f32 %v1235_v6, %v3531_v28 }
 0x1a8   : > { %v1265_v14 = vmul.f32 %v1249_v51, %v3443_v4  ;;  %v1330_v29 = vsel %vm1314_vm10, %v1263_v44, 0.0  ;;  %v1302_v39 = vadd.s32 %v3515_v0, %v1285_v59  ;;  %vm1316_vm12 = vcmp.lt.s32.totalorder %v1300_v37, 781 }
 0x1a9   : > { %v1345_v25 = vadd.f32 %v1344_v47, %v1329_v58  ;;  %v1252_v30 = vmul.f32 %v1236_v56, %v3538_v13  ;;  %v1266_v11 = vmul.f32 %v1250_v22, %v3446_v16  ;;  %v1331_v26 = vsel %vm1315_vm11, %v1264_v34, 0.0 }
 0x1aa   : > { %v1303_v2 = vadd.s32 %v3515_v0, %v1286_v53  ;;  %vm1317_vm13 = vcmp.lt.s32.totalorder %v1301_v54, 781  ;;  %v1267_v28 = vmul.f32 %v1251_v1, %v3450_v36  ;;  %v1332_v8 = vsel %vm1316_vm12, %v1265_v14, 0.0 }
 0x1ab   : > { %v1346_v45 = vadd.f32 %v1345_v25, %v1330_v29  ;;  %vm1318_vm14 = vcmp.lt.s32.totalorder %v1302_v39, 781  ;;  %v1268_v27 = vmul.f32 %v1252_v30, %v3453_v55  ;;  %v1333_v48 = vsel %vm1317_vm13, %v1266_v11, 0.0 }
 0x1ac   : > { %vm1319_vm15 = vcmp.lt.s32.totalorder %v1303_v2, 781  ;;  %v1334_v13 = vsel %vm1318_vm14, %v1267_v28, 0.0 }
 0x1ad   : > { %v1347_v4 = vadd.f32 %v1346_v45, %v1331_v26  ;;  %v1335_v16 = vsel %vm1319_vm15, %v1268_v27, 0.0 }
 0x1af   : > { %v1348_v17 = vadd.f32 %v1347_v4, %v1332_v8 }
 0x1b1   : > { %v1349_v21 = vadd.f32 %v1348_v17, %v1333_v48 }
 0x1b3   : > { %v1350_v7 = vadd.f32 %v1349_v21, %v1334_v13 }
 0x1b5   : > { %v1351_v40 = vadd.f32 %v1350_v7, %v1335_v16 }
 0x1b7   : > { %v1352_v0 = vadd.f32 %v1351_v40, %v1336_v41 }
 0x1b9   : > { %1353 = vst [vmem:[%s2332_s24] sm:$0xff] %v1352_v0 }
 0x1ba PF: > { %s1508_s15 = sshll.u32 %s2077_s16, 3  ;;  %s1367_s28 = sshll.u32 %s2332_s24, 4  ;;  %s1368_s28 = int_to_ptr.vmem [resolvable:$true] %s1367_s28 }
 0x1bb   : > { %s1365_s18 = scalar_lea.hbm %s3656_s2, %s1508_s15  ;;  %s1355_s21 = scalar_lea.sflag [#allocation4], %s253_s30 }
 0x1bc   : > { %s1369_s6 = sshll.u32 %s1365_s18, 4  ;;  %s1983_s16 = scalar_lea.hbm %s3656_s2, 16  ;;  %s1370_s6 = int_to_ptr.hbm [resolvable:$true] %s1369_s6 }
 0x1bd   : > { %s1977_s25 = sshra.s32 %s1370_s6, 4  ;;  %s1978_s25 = int_to_ptr.hbm [resolvable:$true] %s1977_s25 }
 0x1be   : > { %s1979_s29 = scalar_lea.hbm %s1978_s25, 8  ;;  %p1984_p6 = scmp.lt.s32.totalorder %s1978_s25, %s3656_s2 }
 0x1bf   : > { %p1980_p0 = scmp.ne.s32.totalorder %s1978_s25, %s1979_s29  ;;  %p1985_p8 = scmp.lt.s32.totalorder %s1983_s16, %s1979_s29 }
 0x1c1   : > { %p1981_p1 = pnand %p1980_p0, %p2217_p2  ;;  %p1986_p10 = por %p1985_p8, %p1984_p6 }
 0x1c3   : > { %p1982_p4 = pneg %p1981_p1 }
 0x1c5   : > { %p1987_p7 = pnand %p1986_p10, %p1982_p4 }
 0x1c7   : > { %1990 = shalt.err (!%p1987_p7)
}
 0x1c8   : > { %1593 = dma.vmem_to_hbm [thread:$0]  (%p2217_p2), %s1368_s28, 128, %s1370_s6, %s1355_s21  }
 0x1c9 PF: > { %p1599_p11 = scmp.ge.s32.totalorder %s2089_s19, 2  ;;  %s1381_s30 = sand.u32 1, %s2049_s9  }
 0x1ca   : > { %s1382_s24 = scalar_lea.sflag [#allocation4], %s1381_s30 }
 0x1cb   : > { %p1596_p12 = pnand %p1599_p11, %p2221_p3 }
 0x1cd   : > { %p1597_p5 = pneg %p1596_p12 }
 0x1cf   : > { %2044 = dma.done.wait (%p1597_p5), %s1382_s24, 128  }
 0x1d0   : > { %2046 = vsyncadd (%p1597_p5), %s1382_s24, 4294967168  ;;  %s21_s19 = sadd.s32 1, %s2089_s19   ;;  %s3851_s8 = sld [smem:[#allocation15_spill]] }
 0x1d1   : > { %p18_p9 = scmp.ge.s32.totalorder %s21_s19, 10   ;;  %s3852_s15 = sld [smem:[#allocation11_spill]] }
 0x1d2   : > { %s3853_s16 = sld [smem:[#allocation12_spill]]  ;;  %s3856_s9 = smov %s2053_s10 }
 0x1d3   : > { %s3854_s17 = sld [smem:[#allocation13_spill]]  ;;  %s3857_s10 = smov %s2057_s11 }
 0x1d4   : > { %s3855_s18 = sld [smem:[#allocation14_spill]]  ;;  %s3858_s11 = smov %s2203_s5 }
 0x1d5   : > { %s3859_s12 = smov %s2065_s13  ;;  %s3860_s13 = smov %s2069_s14 }
 0x1d6   : > { %s3861_s14 = smov %s3851_s8  ;;  %20 = sbr.rel (!%p18_p9) target bundleno = 13 (0xd), region = 98 }
 0x1db   :  { %1388 = vsyncpa [#allocation3], 1 }
 0x1dc   :  { %1390 = vsyncpa [#allocation3 + $0x1], 1 }
 0x1dd   :  { %1391 = vsyncpa [#allocation6], 1 }
 0x1de   :  { %1393 = vsyncpa [#allocation6 + $0x1], 1 }
 0x1df   :  { %1394 = vsyncpa [#allocation4], 1 }
 0x1e0   :  { %1396 = vsyncpa [#allocation4 + $0x1], 1 }

</bundles_post_ra>
